<compile_context>
chip_gen: v5e
topology: v5e:2x2
jax: 0.10.0
libtpu: 0.0.40
codegen_flags: <defaults>
</compile_context>

<pallas_src>
import numpy as np
import jax
import jax.numpy as jnp
from jax import lax
from jax.experimental import pallas as pl
from jax.experimental.pallas import tpu as pltpu


# ----------------------------------------------------------------------------
# Pallas kernel
# ----------------------------------------------------------------------------
def birnn_kernel(ids_ref,      # (T, BT, 1)  time-major token ids (int32)
                 eproj_f_ref,  # (V_pad, 4H) emb @ W_ih_f^T + bias (g cols x2), mm dtype
                 eproj_b_ref,  # (V_pad, 4H) emb @ W_ih_b^T + bias (g cols x2), mm dtype
                 whh_f_ref,    # (H, 4H)     forward W_hh^T (g cols x2), mm dtype
                 w1_ref,       # (2H, 128)   linear1 weight^T, lane-padded, mm dtype
                 b1_ref,       # (1, 128)    linear1 bias, lane-padded, f32
                 w2_ref,       # (128, 128)  linear2 weight^T, lane-padded, mm dtype
                 b2_ref,       # (1, 128)    linear2 bias, lane-padded, f32
                 o_ref):       # (BT, 128)   sigmoid probs (lane-dense store, f32)
    T, B, _ = ids_ref.shape
    V_pad = eproj_f_ref.shape[0]
    H = whh_f_ref.shape[0]
    mm_dtype = eproj_f_ref.dtype

    # ---- Fused embedding gather + input projection: one-hot MXU matmul -----
    ids3 = ids_ref[...]                                             # (T, B, 1)
    iota3 = lax.broadcasted_iota(jnp.int32, (T, B, V_pad), 2)
    oh3 = jnp.where(ids3 == iota3, 1.0, 0.0)                        # f32 one-hot
    onehot = oh3.reshape(T * B, V_pad).astype(mm_dtype)             # (T*B, V_pad)
    # Forward-direction gate pre-activations for ALL time steps (bias folded).
    gates_xf = jnp.dot(onehot, eproj_f_ref[...],
                       preferred_element_type=jnp.float32)          # (T*B, 4H)

    Whh = whh_f_ref[...]

    def gate_act(g):
        # ONE full-width sigmoid pass over the packed (B, 4H) gates; the
        # g-gate pre-activation was pre-scaled by 2 so tanh(x) = 2*sig(2x)-1.
        s = jax.nn.sigmoid(g)
        i_g = s[:, 0 * H:1 * H]
        f_g = s[:, 1 * H:2 * H]
        g_g = 2.0 * s[:, 2 * H:3 * H] - 1.0
        o_g = s[:, 3 * H:4 * H]
        return i_g, f_g, g_g, o_g

    # ---- Forward direction: fully unrolled recurrence (static T) -----------
    h = jnp.zeros((B, H), jnp.float32)
    c = jnp.zeros((B, H), jnp.float32)
    for t in range(T):
        g = gates_xf[t * B:(t + 1) * B, :] + jnp.dot(
            h.astype(mm_dtype), Whh, preferred_element_type=jnp.float32)
        i_g, f_g, g_g, o_g = gate_act(g)
        c = f_g * c + i_g * g_g
        h = o_g * jnp.tanh(c)
    h_fwd = h

    # ---- Backward direction: single step at t = T-1 from zero state --------
    oh_last = oh3[T - 1].astype(mm_dtype)                           # (B, V_pad)
    gb = jnp.dot(oh_last, eproj_b_ref[...],
                 preferred_element_type=jnp.float32)                # (B, 4H)
    i_g, f_g, g_g, o_g = gate_act(gb)
    h_bwd = o_g * jnp.tanh(i_g * g_g)                               # f_g * c0 == 0

    # ---- MLP head (lane-padded, dense output store) -------------------------
    feat = jnp.concatenate([h_fwd, h_bwd], axis=1)                  # (B, 2H)
    z1 = jnp.dot(feat.astype(mm_dtype), w1_ref[...],
                 preferred_element_type=jnp.float32) + b1_ref[...]
    z1 = jnp.maximum(z1, 0.0)                                       # ReLU
    z2 = jnp.dot(z1.astype(mm_dtype), w2_ref[...],
                 preferred_element_type=jnp.float32) + b2_ref[...]
    o_ref[...] = jax.nn.sigmoid(z2)                                 # (BT, 128)


# ----------------------------------------------------------------------------
# One-time parameter preparation (hoisted out of the per-call path)
# ----------------------------------------------------------------------------
def prepare_params(params, *, matmul_dtype=jnp.bfloat16):
    hp = lax.Precision.HIGHEST
    emb = params["embedding"].astype(jnp.float32)            # (V, E)
    V, _ = emb.shape
    H = params["weight_hh_f"].shape[1]
    C = params["linear2_w"].shape[0]
    HID1 = params["linear1_w"].shape[0]                      # 100
    V_pad = 128 * pl.cdiv(V, 128)
    H1_pad, C_pad = 128, 128

    # tanh identity prescale: g-gate block (columns 2H:3H) scaled by 2.
    gscale = jnp.concatenate(
        [jnp.ones((2 * H,), jnp.float32),
         jnp.full((H,), 2.0, jnp.float32),
         jnp.ones((H,), jnp.float32)])                        # (4H,)

    def make_eproj(wih, bih, bhh):
        # Pre-fold embedding lookup with the input projection and fused bias.
        tab = jnp.dot(emb, wih.T, precision=hp) + (bih + bhh)[None, :]
        tab = tab * gscale[None, :]
        out = jnp.zeros((V_pad, 4 * H), jnp.float32).at[:V, :].set(tab)
        return out.astype(matmul_dtype)

    eproj_f = make_eproj(params["weight_ih_f"], params["bias_ih_f"],
                         params["bias_hh_f"])
    eproj_b = make_eproj(params["weight_ih_b"], params["bias_ih_b"],
                         params["bias_hh_b"])
    # W_hh_b is mathematically unused (single backward step from h0 = 0).
    whh_f = (params["weight_hh_f"].T * gscale[None, :]).astype(matmul_dtype)

    w1 = params["linear1_w"].T                                # (2H, 100)
    w1p = jnp.zeros((2 * H, H1_pad), jnp.float32).at[:, :HID1].set(w1)
    w1p = w1p.astype(matmul_dtype)
    b1p = jnp.zeros((1, H1_pad), jnp.float32).at[:, :HID1].set(
        params["linear1_b"][None, :])
    w2 = params["linear2_w"].T                                # (100, C)
    w2p = jnp.zeros((H1_pad, C_pad), jnp.float32).at[:HID1, :C].set(w2)
    w2p = w2p.astype(matmul_dtype)
    b2p = jnp.zeros((1, C_pad), jnp.float32).at[:, :C].set(
        params["linear2_b"][None, :])

    return {
        "eproj_f": eproj_f, "eproj_b": eproj_b, "whh_f": whh_f,
        "w1": w1p, "b1": b1p, "w2": w2p, "b2": b2p,
        "hidden": int(H), "classes": int(C),
    }


# ----------------------------------------------------------------------------
# Per-call wrapper: tiny id reshuffle + pallas_call (batch-parallel grid)
# ----------------------------------------------------------------------------
def birnn_forward(x_ids, prep):
    B, T = x_ids.shape
    H = prep["hidden"]
    C = prep["classes"]
    C_pad = prep["b2"].shape[1]
    V_pad = prep["eproj_f"].shape[0]

    B_pad = max(8, ((B + 7) // 8) * 8)
    if B_pad <= 128:
        BT = B_pad
    else:
        BT = 128
        B_pad = 128 * pl.cdiv(B_pad, 128)
    n_btiles = B_pad // BT

    # Only per-call glue: pad batch (pad rows use token 0 -> valid, sliced off),
    # go time-major.  This is a handful of int32 elements.
    ids = jnp.pad(x_ids.astype(jnp.int32), ((0, B_pad - B), (0, 0)))  # (B_pad, T)
    ids_tm = ids.T[:, :, None]                                        # (T, B_pad, 1)

    args = (ids_tm, prep["eproj_f"], prep["eproj_b"], prep["whh_f"],
            prep["w1"], prep["b1"], prep["w2"], prep["b2"])

    def full_spec(a):
        return pl.BlockSpec(a.shape, lambda i, _nd=a.ndim: (0,) * _nd)

    in_specs = [
        pl.BlockSpec((T, BT, 1), lambda i: (0, i, 0)),
        full_spec(prep["eproj_f"]), full_spec(prep["eproj_b"]),
        full_spec(prep["whh_f"]),
        full_spec(prep["w1"]), full_spec(prep["b1"]),
        full_spec(prep["w2"]), full_spec(prep["b2"]),
    ]
    out_spec = pl.BlockSpec((BT, C_pad), lambda i: (i, 0))

    flops = int(2 * T * B_pad * V_pad * 4 * H        # one-hot gather+proj, fwd
                + 2 * B_pad * V_pad * 4 * H          # one-hot gather+proj, bwd
                + 2 * T * B_pad * H * 4 * H          # recurrent h @ Whh
                + 2 * B_pad * (2 * H * 128 + 128 * 128))
    transcendentals = int((T + 1) * B_pad * 5 * H + B_pad * C_pad)
    bytes_accessed = int(sum(int(np.prod(a.shape)) * a.dtype.itemsize
                             for a in args) + B_pad * C_pad * 4)

    out = pl.pallas_call(
        birnn_kernel,
        out_shape=jax.ShapeDtypeStruct((B_pad, C_pad), jnp.float32),
        grid=(n_btiles,),
        in_specs=in_specs,
        out_specs=out_spec,
        compiler_params=pltpu.CompilerParams(
            dimension_semantics=("parallel",)),
        cost_estimate=pl.CostEstimate(
            flops=flops, transcendentals=transcendentals,
            bytes_accessed=bytes_accessed),
    )(*args)
    return out[:B, :C]


# ----------------------------------------------------------------------------
# Pure-JAX reference (HIGHEST-precision matmuls for a tight tolerance check)
# ----------------------------------------------------------------------------
def birnn_reference(x_ids, params):
    hp = lax.Precision.HIGHEST
    H = params["weight_hh_f"].shape[1]
    emb = params["embedding"][x_ids].astype(jnp.float32)       # (B, T, 100)
    B, T, _ = emb.shape

    def cell(x_t, h, c, wih, whh, bih, bhh):
        g = (jnp.dot(x_t, wih.T, precision=hp) + bih
             + jnp.dot(h, whh.T, precision=hp) + bhh)
        i, f, gg, o = jnp.split(g, 4, axis=1)
        c = jax.nn.sigmoid(f) * c + jax.nn.sigmoid(i) * jnp.tanh(gg)
        h = jax.nn.sigmoid(o) * jnp.tanh(c)
        return h, c

    h = jnp.zeros((B, H), jnp.float32)
    c = jnp.zeros((B, H), jnp.float32)
    for t in range(T):
        h, c = cell(emb[:, t], h, c, params["weight_ih_f"], params["weight_hh_f"],
                    params["bias_ih_f"], params["bias_hh_f"])
    h_fwd = h
    h_bwd, _ = cell(emb[:, T - 1], jnp.zeros((B, H)), jnp.zeros((B, H)),
                    params["weight_ih_b"], params["weight_hh_b"],
                    params["bias_ih_b"], params["bias_hh_b"])
    feat = jnp.concatenate([h_fwd, h_bwd], axis=1)
    z = jnp.maximum(jnp.dot(feat, params["linear1_w"].T, precision=hp)
                    + params["linear1_b"], 0.0)
    z = jnp.dot(z, params["linear2_w"].T, precision=hp) + params["linear2_b"]
    return jax.nn.sigmoid(z)


# ----------------------------------------------------------------------------
# Deterministic parameter init (shapes follow nn.LSTM / nn.Linear in __init__)
# ----------------------------------------------------------------------------
def init_params(key, vocab, embed_dim, hidden, classes):
    ks = jax.random.split(key, 16)
    s = 1.0 / np.sqrt(hidden)
    u = lambda k, shape: jax.random.uniform(k, shape, jnp.float32, -s, s)
    return {
        "embedding":   jax.random.normal(ks[0], (vocab, embed_dim), jnp.float32),
        # forward direction
        "weight_ih_f": u(ks[1], (4 * hidden, embed_dim)),
        "weight_hh_f": u(ks[2], (4 * hidden, hidden)),
        "bias_ih_f":   u(ks[3], (4 * hidden,)),
        "bias_hh_f":   u(ks[4], (4 * hidden,)),
        # backward direction
        "weight_ih_b": u(ks[5], (4 * hidden, embed_dim)),
        "weight_hh_b": u(ks[6], (4 * hidden, hidden)),
        "bias_ih_b":   u(ks[7], (4 * hidden,)),
        "bias_hh_b":   u(ks[8], (4 * hidden,)),
        # MLP head
        "linear1_w":   u(ks[9],  (100, 2 * hidden)),
        "linear1_b":   u(ks[10], (100,)),
        "linear2_w":   u(ks[11], (classes, 100)),
        "linear2_b":   u(ks[12], (classes,)),
    }


if __name__ == "__main__":
    batch_size, seq_len, hidden_size, classes = 2, 8, 32, 6
    vocab, embed_dim = 50, 100                    # LSTM input size is fixed to 100

    key = jax.random.PRNGKey(0)
    pkey, xkey = jax.random.split(key)
    params = init_params(pkey, vocab, embed_dim, hidden_size, classes)
    x_ids = jax.random.randint(xkey, (batch_size, seq_len), 0, vocab,
                               dtype=jnp.int32)

    ref = jax.block_until_ready(birnn_reference(x_ids, params))

    # Strict correctness path: f32 MXU operands / tables, tight tolerance.
    prep_f32 = prepare_params(params, matmul_dtype=jnp.float32)
    out_f32 = jax.block_until_ready(birnn_forward(x_ids, prep_f32))
    assert out_f32.shape == (batch_size, classes)
    np.testing.assert_allclose(np.asarray(out_f32), np.asarray(ref),
                               rtol=1e-4, atol=1e-4)

    # Performance path: bf16 MXU operands, f32 accumulation / gate math.
    prep_bf16 = prepare_params(params, matmul_dtype=jnp.bfloat16)
    out_bf16 = jax.block_until_ready(birnn_forward(x_ids, prep_bf16))
    assert out_bf16.shape == (batch_size, classes)
    np.testing.assert_allclose(np.asarray(out_bf16), np.asarray(ref),
                               rtol=2e-2, atol=2e-2)

    print("KERNEL_OK")
</pallas_src>

<mosaic_0001>
module attributes {stable_mosaic.version = 11 : i64} {
  func.func @birnn_kernel(%arg0: i32, %arg1: memref<8x8x1xi32, #tpu.memory_space<vmem>>, %arg2: memref<128x128xf32, #tpu.memory_space<vmem>>, %arg3: memref<128x128xf32, #tpu.memory_space<vmem>>, %arg4: memref<32x128xf32, #tpu.memory_space<vmem>>, %arg5: memref<64x128xf32, #tpu.memory_space<vmem>>, %arg6: memref<1x128xf32, #tpu.memory_space<vmem>>, %arg7: memref<128x128xf32, #tpu.memory_space<vmem>>, %arg8: memref<1x128xf32, #tpu.memory_space<vmem>>, %arg9: memref<8x128xf32, #tpu.memory_space<vmem>>) attributes {dimension_semantics = [#tpu.dimension_semantics<parallel>], iteration_bounds = array<i64: 1>, scalar_prefetch = 0 : i64, scratch_operands = 0 : i64, tpu.core_type = #tpu.core_type<tc>, window_params = [{transform_indices = @transform_0, window_bounds = array<i64: 8, 8, 1>}, {pipeline_mode = #tpu.pipeline_mode<synchronous>, transform_indices = @transform_1, window_bounds = array<i64: 128, 128>}, {pipeline_mode = #tpu.pipeline_mode<synchronous>, transform_indices = @transform_2, window_bounds = array<i64: 128, 128>}, {pipeline_mode = #tpu.pipeline_mode<synchronous>, transform_indices = @transform_3, window_bounds = array<i64: 32, 128>}, {pipeline_mode = #tpu.pipeline_mode<synchronous>, transform_indices = @transform_4, window_bounds = array<i64: 64, 128>}, {pipeline_mode = #tpu.pipeline_mode<synchronous>, transform_indices = @transform_5, window_bounds = array<i64: 1, 128>}, {pipeline_mode = #tpu.pipeline_mode<synchronous>, transform_indices = @transform_6, window_bounds = array<i64: 128, 128>}, {pipeline_mode = #tpu.pipeline_mode<synchronous>, transform_indices = @transform_7, window_bounds = array<i64: 1, 128>}, {transform_indices = @transform_8, window_bounds = array<i64: 8, 128>}]} {
    %c0 = arith.constant 0 : index
    %c0_0 = arith.constant 0 : index
    %c0_1 = arith.constant 0 : index
    %0 = vector.load %arg1[%c0, %c0_0, %c0_1] : memref<8x8x1xi32, #tpu.memory_space<vmem>>, vector<8x8x1xi32>
    %1 = tpu.iota {dimensions = array<i32: 2>} : vector<8x8x128xi32>
    %2 = vector.broadcast %0 : vector<8x8x1xi32> to vector<8x8x128xi32>
    %3 = arith.cmpi eq, %2, %1 : vector<8x8x128xi32>
    %cst = arith.constant 1.000000e+00 : f32
    %cst_2 = arith.constant 0.000000e+00 : f32
    %4 = vector.broadcast %cst : f32 to vector<8x8x128xf32>
    %5 = vector.broadcast %cst_2 : f32 to vector<8x8x128xf32>
    %6 = arith.select %3, %4, %5 : vector<8x8x128xi1>, vector<8x8x128xf32>
    %7 = vector.shape_cast %6 : vector<8x8x128xf32> to vector<64x128xf32>
    %c0_3 = arith.constant 0 : index
    %c0_4 = arith.constant 0 : index
    %8 = vector.load %arg2[%c0_3, %c0_4] : memref<128x128xf32, #tpu.memory_space<vmem>>, vector<128x128xf32>
    %cst_5 = arith.constant dense<0.000000e+00> : vector<64x128xf32>
    %9 = tpu.matmul %7, %8, %cst_5 {dimension_numbers = #tpu.dot_dimension_numbers<[1], [0], [0], [1], [0, 0, 1, 1], [], []>} : vector<64x128xf32>, vector<128x128xf32>, vector<64x128xf32> -> vector<64x128xf32>
    %c0_6 = arith.constant 0 : index
    %c0_7 = arith.constant 0 : index
    %10 = vector.load %arg4[%c0_6, %c0_7] : memref<32x128xf32, #tpu.memory_space<vmem>>, vector<32x128xf32>
    %cst_8 = arith.constant 0.000000e+00 : f32
    %11 = vector.broadcast %cst_8 : f32 to vector<8x32xf32>
    %cst_9 = arith.constant 0.000000e+00 : f32
    %12 = vector.broadcast %cst_9 : f32 to vector<8x32xf32>
    %13 = vector.extract_strided_slice %9 {offsets = [0, 0], sizes = [8, 128], strides = [1, 1]} : vector<64x128xf32> to vector<8x128xf32>
    %cst_10 = arith.constant dense<0.000000e+00> : vector<8x128xf32>
    %14 = tpu.matmul %11, %10, %cst_10 {dimension_numbers = #tpu.dot_dimension_numbers<[1], [0], [0], [1], [0, 0, 1, 1], [], []>} : vector<8x32xf32>, vector<32x128xf32>, vector<8x128xf32> -> vector<8x128xf32>
    %15 = arith.addf %13, %14 : vector<8x128xf32>
    %16 = arith.negf %15 : vector<8x128xf32>
    %17 = math.exp %16 : vector<8x128xf32>
    %cst_11 = arith.constant 1.000000e+00 : f32
    %18 = vector.broadcast %cst_11 : f32 to vector<8x128xf32>
    %19 = arith.addf %18, %17 : vector<8x128xf32>
    %20 = arith.divf %18, %19 : vector<8x128xf32>
    %21 = vector.extract_strided_slice %20 {offsets = [0, 0], sizes = [8, 32], strides = [1, 1]} : vector<8x128xf32> to vector<8x32xf32>
    %22 = vector.extract_strided_slice %20 {offsets = [0, 32], sizes = [8, 32], strides = [1, 1]} : vector<8x128xf32> to vector<8x32xf32>
    %23 = vector.extract_strided_slice %20 {offsets = [0, 64], sizes = [8, 32], strides = [1, 1]} : vector<8x128xf32> to vector<8x32xf32>
    %cst_12 = arith.constant 2.000000e+00 : f32
    %24 = vector.broadcast %cst_12 : f32 to vector<8x32xf32>
    %25 = arith.mulf %24, %23 : vector<8x32xf32>
    %cst_13 = arith.constant 1.000000e+00 : f32
    %26 = vector.broadcast %cst_13 : f32 to vector<8x32xf32>
    %27 = arith.subf %25, %26 : vector<8x32xf32>
    %28 = vector.extract_strided_slice %20 {offsets = [0, 96], sizes = [8, 32], strides = [1, 1]} : vector<8x128xf32> to vector<8x32xf32>
    %29 = arith.mulf %22, %12 : vector<8x32xf32>
    %30 = arith.mulf %21, %27 : vector<8x32xf32>
    %31 = arith.addf %29, %30 : vector<8x32xf32>
    %32 = math.tanh %31 : vector<8x32xf32>
    %33 = arith.mulf %28, %32 : vector<8x32xf32>
    %34 = vector.extract_strided_slice %9 {offsets = [8, 0], sizes = [8, 128], strides = [1, 1]} : vector<64x128xf32> to vector<8x128xf32>
    %cst_14 = arith.constant dense<0.000000e+00> : vector<8x128xf32>
    %35 = tpu.matmul %33, %10, %cst_14 {dimension_numbers = #tpu.dot_dimension_numbers<[1], [0], [0], [1], [0, 0, 1, 1], [], []>} : vector<8x32xf32>, vector<32x128xf32>, vector<8x128xf32> -> vector<8x128xf32>
    %36 = arith.addf %34, %35 : vector<8x128xf32>
    %37 = arith.negf %36 : vector<8x128xf32>
    %38 = math.exp %37 : vector<8x128xf32>
    %cst_15 = arith.constant 1.000000e+00 : f32
    %39 = vector.broadcast %cst_15 : f32 to vector<8x128xf32>
    %40 = arith.addf %39, %38 : vector<8x128xf32>
    %41 = arith.divf %39, %40 : vector<8x128xf32>
    %42 = vector.extract_strided_slice %41 {offsets = [0, 0], sizes = [8, 32], strides = [1, 1]} : vector<8x128xf32> to vector<8x32xf32>
    %43 = vector.extract_strided_slice %41 {offsets = [0, 32], sizes = [8, 32], strides = [1, 1]} : vector<8x128xf32> to vector<8x32xf32>
    %44 = vector.extract_strided_slice %41 {offsets = [0, 64], sizes = [8, 32], strides = [1, 1]} : vector<8x128xf32> to vector<8x32xf32>
    %cst_16 = arith.constant 2.000000e+00 : f32
    %45 = vector.broadcast %cst_16 : f32 to vector<8x32xf32>
    %46 = arith.mulf %45, %44 : vector<8x32xf32>
    %cst_17 = arith.constant 1.000000e+00 : f32
    %47 = vector.broadcast %cst_17 : f32 to vector<8x32xf32>
    %48 = arith.subf %46, %47 : vector<8x32xf32>
    %49 = vector.extract_strided_slice %41 {offsets = [0, 96], sizes = [8, 32], strides = [1, 1]} : vector<8x128xf32> to vector<8x32xf32>
    %50 = arith.mulf %43, %31 : vector<8x32xf32>
    %51 = arith.mulf %42, %48 : vector<8x32xf32>
    %52 = arith.addf %50, %51 : vector<8x32xf32>
    %53 = math.tanh %52 : vector<8x32xf32>
    %54 = arith.mulf %49, %53 : vector<8x32xf32>
    %55 = vector.extract_strided_slice %9 {offsets = [16, 0], sizes = [8, 128], strides = [1, 1]} : vector<64x128xf32> to vector<8x128xf32>
    %cst_18 = arith.constant dense<0.000000e+00> : vector<8x128xf32>
    %56 = tpu.matmul %54, %10, %cst_18 {dimension_numbers = #tpu.dot_dimension_numbers<[1], [0], [0], [1], [0, 0, 1, 1], [], []>} : vector<8x32xf32>, vector<32x128xf32>, vector<8x128xf32> -> vector<8x128xf32>
    %57 = arith.addf %55, %56 : vector<8x128xf32>
    %58 = arith.negf %57 : vector<8x128xf32>
    %59 = math.exp %58 : vector<8x128xf32>
    %cst_19 = arith.constant 1.000000e+00 : f32
    %60 = vector.broadcast %cst_19 : f32 to vector<8x128xf32>
    %61 = arith.addf %60, %59 : vector<8x128xf32>
    %62 = arith.divf %60, %61 : vector<8x128xf32>
    %63 = vector.extract_strided_slice %62 {offsets = [0, 0], sizes = [8, 32], strides = [1, 1]} : vector<8x128xf32> to vector<8x32xf32>
    %64 = vector.extract_strided_slice %62 {offsets = [0, 32], sizes = [8, 32], strides = [1, 1]} : vector<8x128xf32> to vector<8x32xf32>
    %65 = vector.extract_strided_slice %62 {offsets = [0, 64], sizes = [8, 32], strides = [1, 1]} : vector<8x128xf32> to vector<8x32xf32>
    %cst_20 = arith.constant 2.000000e+00 : f32
    %66 = vector.broadcast %cst_20 : f32 to vector<8x32xf32>
    %67 = arith.mulf %66, %65 : vector<8x32xf32>
    %cst_21 = arith.constant 1.000000e+00 : f32
    %68 = vector.broadcast %cst_21 : f32 to vector<8x32xf32>
    %69 = arith.subf %67, %68 : vector<8x32xf32>
    %70 = vector.extract_strided_slice %62 {offsets = [0, 96], sizes = [8, 32], strides = [1, 1]} : vector<8x128xf32> to vector<8x32xf32>
    %71 = arith.mulf %64, %52 : vector<8x32xf32>
    %72 = arith.mulf %63, %69 : vector<8x32xf32>
    %73 = arith.addf %71, %72 : vector<8x32xf32>
    %74 = math.tanh %73 : vector<8x32xf32>
    %75 = arith.mulf %70, %74 : vector<8x32xf32>
    %76 = vector.extract_strided_slice %9 {offsets = [24, 0], sizes = [8, 128], strides = [1, 1]} : vector<64x128xf32> to vector<8x128xf32>
    %cst_22 = arith.constant dense<0.000000e+00> : vector<8x128xf32>
    %77 = tpu.matmul %75, %10, %cst_22 {dimension_numbers = #tpu.dot_dimension_numbers<[1], [0], [0], [1], [0, 0, 1, 1], [], []>} : vector<8x32xf32>, vector<32x128xf32>, vector<8x128xf32> -> vector<8x128xf32>
    %78 = arith.addf %76, %77 : vector<8x128xf32>
    %79 = arith.negf %78 : vector<8x128xf32>
    %80 = math.exp %79 : vector<8x128xf32>
    %cst_23 = arith.constant 1.000000e+00 : f32
    %81 = vector.broadcast %cst_23 : f32 to vector<8x128xf32>
    %82 = arith.addf %81, %80 : vector<8x128xf32>
    %83 = arith.divf %81, %82 : vector<8x128xf32>
    %84 = vector.extract_strided_slice %83 {offsets = [0, 0], sizes = [8, 32], strides = [1, 1]} : vector<8x128xf32> to vector<8x32xf32>
    %85 = vector.extract_strided_slice %83 {offsets = [0, 32], sizes = [8, 32], strides = [1, 1]} : vector<8x128xf32> to vector<8x32xf32>
    %86 = vector.extract_strided_slice %83 {offsets = [0, 64], sizes = [8, 32], strides = [1, 1]} : vector<8x128xf32> to vector<8x32xf32>
    %cst_24 = arith.constant 2.000000e+00 : f32
    %87 = vector.broadcast %cst_24 : f32 to vector<8x32xf32>
    %88 = arith.mulf %87, %86 : vector<8x32xf32>
    %cst_25 = arith.constant 1.000000e+00 : f32
    %89 = vector.broadcast %cst_25 : f32 to vector<8x32xf32>
    %90 = arith.subf %88, %89 : vector<8x32xf32>
    %91 = vector.extract_strided_slice %83 {offsets = [0, 96], sizes = [8, 32], strides = [1, 1]} : vector<8x128xf32> to vector<8x32xf32>
    %92 = arith.mulf %85, %73 : vector<8x32xf32>
    %93 = arith.mulf %84, %90 : vector<8x32xf32>
    %94 = arith.addf %92, %93 : vector<8x32xf32>
    %95 = math.tanh %94 : vector<8x32xf32>
    %96 = arith.mulf %91, %95 : vector<8x32xf32>
    %97 = vector.extract_strided_slice %9 {offsets = [32, 0], sizes = [8, 128], strides = [1, 1]} : vector<64x128xf32> to vector<8x128xf32>
    %cst_26 = arith.constant dense<0.000000e+00> : vector<8x128xf32>
    %98 = tpu.matmul %96, %10, %cst_26 {dimension_numbers = #tpu.dot_dimension_numbers<[1], [0], [0], [1], [0, 0, 1, 1], [], []>} : vector<8x32xf32>, vector<32x128xf32>, vector<8x128xf32> -> vector<8x128xf32>
    %99 = arith.addf %97, %98 : vector<8x128xf32>
    %100 = arith.negf %99 : vector<8x128xf32>
    %101 = math.exp %100 : vector<8x128xf32>
    %cst_27 = arith.constant 1.000000e+00 : f32
    %102 = vector.broadcast %cst_27 : f32 to vector<8x128xf32>
    %103 = arith.addf %102, %101 : vector<8x128xf32>
    %104 = arith.divf %102, %103 : vector<8x128xf32>
    %105 = vector.extract_strided_slice %104 {offsets = [0, 0], sizes = [8, 32], strides = [1, 1]} : vector<8x128xf32> to vector<8x32xf32>
    %106 = vector.extract_strided_slice %104 {offsets = [0, 32], sizes = [8, 32], strides = [1, 1]} : vector<8x128xf32> to vector<8x32xf32>
    %107 = vector.extract_strided_slice %104 {offsets = [0, 64], sizes = [8, 32], strides = [1, 1]} : vector<8x128xf32> to vector<8x32xf32>
    %cst_28 = arith.constant 2.000000e+00 : f32
    %108 = vector.broadcast %cst_28 : f32 to vector<8x32xf32>
    %109 = arith.mulf %108, %107 : vector<8x32xf32>
    %cst_29 = arith.constant 1.000000e+00 : f32
    %110 = vector.broadcast %cst_29 : f32 to vector<8x32xf32>
    %111 = arith.subf %109, %110 : vector<8x32xf32>
    %112 = vector.extract_strided_slice %104 {offsets = [0, 96], sizes = [8, 32], strides = [1, 1]} : vector<8x128xf32> to vector<8x32xf32>
    %113 = arith.mulf %106, %94 : vector<8x32xf32>
    %114 = arith.mulf %105, %111 : vector<8x32xf32>
    %115 = arith.addf %113, %114 : vector<8x32xf32>
    %116 = math.tanh %115 : vector<8x32xf32>
    %117 = arith.mulf %112, %116 : vector<8x32xf32>
    %118 = vector.extract_strided_slice %9 {offsets = [40, 0], sizes = [8, 128], strides = [1, 1]} : vector<64x128xf32> to vector<8x128xf32>
    %cst_30 = arith.constant dense<0.000000e+00> : vector<8x128xf32>
    %119 = tpu.matmul %117, %10, %cst_30 {dimension_numbers = #tpu.dot_dimension_numbers<[1], [0], [0], [1], [0, 0, 1, 1], [], []>} : vector<8x32xf32>, vector<32x128xf32>, vector<8x128xf32> -> vector<8x128xf32>
    %120 = arith.addf %118, %119 : vector<8x128xf32>
    %121 = arith.negf %120 : vector<8x128xf32>
    %122 = math.exp %121 : vector<8x128xf32>
    %cst_31 = arith.constant 1.000000e+00 : f32
    %123 = vector.broadcast %cst_31 : f32 to vector<8x128xf32>
    %124 = arith.addf %123, %122 : vector<8x128xf32>
    %125 = arith.divf %123, %124 : vector<8x128xf32>
    %126 = vector.extract_strided_slice %125 {offsets = [0, 0], sizes = [8, 32], strides = [1, 1]} : vector<8x128xf32> to vector<8x32xf32>
    %127 = vector.extract_strided_slice %125 {offsets = [0, 32], sizes = [8, 32], strides = [1, 1]} : vector<8x128xf32> to vector<8x32xf32>
    %128 = vector.extract_strided_slice %125 {offsets = [0, 64], sizes = [8, 32], strides = [1, 1]} : vector<8x128xf32> to vector<8x32xf32>
    %cst_32 = arith.constant 2.000000e+00 : f32
    %129 = vector.broadcast %cst_32 : f32 to vector<8x32xf32>
    %130 = arith.mulf %129, %128 : vector<8x32xf32>
    %cst_33 = arith.constant 1.000000e+00 : f32
    %131 = vector.broadcast %cst_33 : f32 to vector<8x32xf32>
    %132 = arith.subf %130, %131 : vector<8x32xf32>
    %133 = vector.extract_strided_slice %125 {offsets = [0, 96], sizes = [8, 32], strides = [1, 1]} : vector<8x128xf32> to vector<8x32xf32>
    %134 = arith.mulf %127, %115 : vector<8x32xf32>
    %135 = arith.mulf %126, %132 : vector<8x32xf32>
    %136 = arith.addf %134, %135 : vector<8x32xf32>
    %137 = math.tanh %136 : vector<8x32xf32>
    %138 = arith.mulf %133, %137 : vector<8x32xf32>
    %139 = vector.extract_strided_slice %9 {offsets = [48, 0], sizes = [8, 128], strides = [1, 1]} : vector<64x128xf32> to vector<8x128xf32>
    %cst_34 = arith.constant dense<0.000000e+00> : vector<8x128xf32>
    %140 = tpu.matmul %138, %10, %cst_34 {dimension_numbers = #tpu.dot_dimension_numbers<[1], [0], [0], [1], [0, 0, 1, 1], [], []>} : vector<8x32xf32>, vector<32x128xf32>, vector<8x128xf32> -> vector<8x128xf32>
    %141 = arith.addf %139, %140 : vector<8x128xf32>
    %142 = arith.negf %141 : vector<8x128xf32>
    %143 = math.exp %142 : vector<8x128xf32>
    %cst_35 = arith.constant 1.000000e+00 : f32
    %144 = vector.broadcast %cst_35 : f32 to vector<8x128xf32>
    %145 = arith.addf %144, %143 : vector<8x128xf32>
    %146 = arith.divf %144, %145 : vector<8x128xf32>
    %147 = vector.extract_strided_slice %146 {offsets = [0, 0], sizes = [8, 32], strides = [1, 1]} : vector<8x128xf32> to vector<8x32xf32>
    %148 = vector.extract_strided_slice %146 {offsets = [0, 32], sizes = [8, 32], strides = [1, 1]} : vector<8x128xf32> to vector<8x32xf32>
    %149 = vector.extract_strided_slice %146 {offsets = [0, 64], sizes = [8, 32], strides = [1, 1]} : vector<8x128xf32> to vector<8x32xf32>
    %cst_36 = arith.constant 2.000000e+00 : f32
    %150 = vector.broadcast %cst_36 : f32 to vector<8x32xf32>
    %151 = arith.mulf %150, %149 : vector<8x32xf32>
    %cst_37 = arith.constant 1.000000e+00 : f32
    %152 = vector.broadcast %cst_37 : f32 to vector<8x32xf32>
    %153 = arith.subf %151, %152 : vector<8x32xf32>
    %154 = vector.extract_strided_slice %146 {offsets = [0, 96], sizes = [8, 32], strides = [1, 1]} : vector<8x128xf32> to vector<8x32xf32>
    %155 = arith.mulf %148, %136 : vector<8x32xf32>
    %156 = arith.mulf %147, %153 : vector<8x32xf32>
    %157 = arith.addf %155, %156 : vector<8x32xf32>
    %158 = math.tanh %157 : vector<8x32xf32>
    %159 = arith.mulf %154, %158 : vector<8x32xf32>
    %160 = vector.extract_strided_slice %9 {offsets = [56, 0], sizes = [8, 128], strides = [1, 1]} : vector<64x128xf32> to vector<8x128xf32>
    %cst_38 = arith.constant dense<0.000000e+00> : vector<8x128xf32>
    %161 = tpu.matmul %159, %10, %cst_38 {dimension_numbers = #tpu.dot_dimension_numbers<[1], [0], [0], [1], [0, 0, 1, 1], [], []>} : vector<8x32xf32>, vector<32x128xf32>, vector<8x128xf32> -> vector<8x128xf32>
    %162 = arith.addf %160, %161 : vector<8x128xf32>
    %163 = arith.negf %162 : vector<8x128xf32>
    %164 = math.exp %163 : vector<8x128xf32>
    %cst_39 = arith.constant 1.000000e+00 : f32
    %165 = vector.broadcast %cst_39 : f32 to vector<8x128xf32>
    %166 = arith.addf %165, %164 : vector<8x128xf32>
    %167 = arith.divf %165, %166 : vector<8x128xf32>
    %168 = vector.extract_strided_slice %167 {offsets = [0, 0], sizes = [8, 32], strides = [1, 1]} : vector<8x128xf32> to vector<8x32xf32>
    %169 = vector.extract_strided_slice %167 {offsets = [0, 32], sizes = [8, 32], strides = [1, 1]} : vector<8x128xf32> to vector<8x32xf32>
    %170 = vector.extract_strided_slice %167 {offsets = [0, 64], sizes = [8, 32], strides = [1, 1]} : vector<8x128xf32> to vector<8x32xf32>
    %cst_40 = arith.constant 2.000000e+00 : f32
    %171 = vector.broadcast %cst_40 : f32 to vector<8x32xf32>
    %172 = arith.mulf %171, %170 : vector<8x32xf32>
    %cst_41 = arith.constant 1.000000e+00 : f32
    %173 = vector.broadcast %cst_41 : f32 to vector<8x32xf32>
    %174 = arith.subf %172, %173 : vector<8x32xf32>
    %175 = vector.extract_strided_slice %167 {offsets = [0, 96], sizes = [8, 32], strides = [1, 1]} : vector<8x128xf32> to vector<8x32xf32>
    %176 = arith.mulf %169, %157 : vector<8x32xf32>
    %177 = arith.mulf %168, %174 : vector<8x32xf32>
    %178 = arith.addf %176, %177 : vector<8x32xf32>
    %179 = math.tanh %178 : vector<8x32xf32>
    %180 = arith.mulf %175, %179 : vector<8x32xf32>
    %181 = vector.extract_strided_slice %6 {offsets = [7, 0, 0], sizes = [1, 8, 128], strides = [1, 1, 1]} : vector<8x8x128xf32> to vector<1x8x128xf32>
    %182 = vector.shape_cast %181 : vector<1x8x128xf32> to vector<8x128xf32>
    %c0_42 = arith.constant 0 : index
    %c0_43 = arith.constant 0 : index
    %183 = vector.load %arg3[%c0_42, %c0_43] : memref<128x128xf32, #tpu.memory_space<vmem>>, vector<128x128xf32>
    %cst_44 = arith.constant dense<0.000000e+00> : vector<8x128xf32>
    %184 = tpu.matmul %182, %183, %cst_44 {dimension_numbers = #tpu.dot_dimension_numbers<[1], [0], [0], [1], [0, 0, 1, 1], [], []>} : vector<8x128xf32>, vector<128x128xf32>, vector<8x128xf32> -> vector<8x128xf32>
    %185 = arith.negf %184 : vector<8x128xf32>
    %186 = math.exp %185 : vector<8x128xf32>
    %cst_45 = arith.constant 1.000000e+00 : f32
    %187 = vector.broadcast %cst_45 : f32 to vector<8x128xf32>
    %188 = arith.addf %187, %186 : vector<8x128xf32>
    %189 = arith.divf %187, %188 : vector<8x128xf32>
    %190 = vector.extract_strided_slice %189 {offsets = [0, 0], sizes = [8, 32], strides = [1, 1]} : vector<8x128xf32> to vector<8x32xf32>
    %191 = vector.extract_strided_slice %189 {offsets = [0, 64], sizes = [8, 32], strides = [1, 1]} : vector<8x128xf32> to vector<8x32xf32>
    %cst_46 = arith.constant 2.000000e+00 : f32
    %192 = vector.broadcast %cst_46 : f32 to vector<8x32xf32>
    %193 = arith.mulf %192, %191 : vector<8x32xf32>
    %cst_47 = arith.constant 1.000000e+00 : f32
    %194 = vector.broadcast %cst_47 : f32 to vector<8x32xf32>
    %195 = arith.subf %193, %194 : vector<8x32xf32>
    %196 = vector.extract_strided_slice %189 {offsets = [0, 96], sizes = [8, 32], strides = [1, 1]} : vector<8x128xf32> to vector<8x32xf32>
    %197 = arith.mulf %190, %195 : vector<8x32xf32>
    %198 = math.tanh %197 : vector<8x32xf32>
    %199 = arith.mulf %196, %198 : vector<8x32xf32>
    %200 = tpu.concatenate %180, %199 in 1 : vector<8x32xf32>, vector<8x32xf32> -> vector<8x64xf32>
    %c0_48 = arith.constant 0 : index
    %c0_49 = arith.constant 0 : index
    %201 = vector.load %arg5[%c0_48, %c0_49] : memref<64x128xf32, #tpu.memory_space<vmem>>, vector<64x128xf32>
    %cst_50 = arith.constant dense<0.000000e+00> : vector<8x128xf32>
    %202 = tpu.matmul %200, %201, %cst_50 {dimension_numbers = #tpu.dot_dimension_numbers<[1], [0], [0], [1], [0, 0, 1, 1], [], []>} : vector<8x64xf32>, vector<64x128xf32>, vector<8x128xf32> -> vector<8x128xf32>
    %c0_51 = arith.constant 0 : index
    %c0_52 = arith.constant 0 : index
    %203 = vector.load %arg6[%c0_51, %c0_52] : memref<1x128xf32, #tpu.memory_space<vmem>>, vector<1x128xf32>
    %204 = vector.broadcast %203 : vector<1x128xf32> to vector<8x128xf32>
    %205 = arith.addf %202, %204 : vector<8x128xf32>
    %cst_53 = arith.constant 0.000000e+00 : f32
    %206 = vector.broadcast %cst_53 : f32 to vector<8x128xf32>
    %207 = arith.maximumf %205, %206 : vector<8x128xf32>
    %c0_54 = arith.constant 0 : index
    %c0_55 = arith.constant 0 : index
    %208 = vector.load %arg7[%c0_54, %c0_55] : memref<128x128xf32, #tpu.memory_space<vmem>>, vector<128x128xf32>
    %cst_56 = arith.constant dense<0.000000e+00> : vector<8x128xf32>
    %209 = tpu.matmul %207, %208, %cst_56 {dimension_numbers = #tpu.dot_dimension_numbers<[1], [0], [0], [1], [0, 0, 1, 1], [], []>} : vector<8x128xf32>, vector<128x128xf32>, vector<8x128xf32> -> vector<8x128xf32>
    %c0_57 = arith.constant 0 : index
    %c0_58 = arith.constant 0 : index
    %210 = vector.load %arg8[%c0_57, %c0_58] : memref<1x128xf32, #tpu.memory_space<vmem>>, vector<1x128xf32>
    %211 = vector.broadcast %210 : vector<1x128xf32> to vector<8x128xf32>
    %212 = arith.addf %209, %211 : vector<8x128xf32>
    %213 = arith.negf %212 : vector<8x128xf32>
    %214 = math.exp %213 : vector<8x128xf32>
    %cst_59 = arith.constant 1.000000e+00 : f32
    %215 = vector.broadcast %cst_59 : f32 to vector<8x128xf32>
    %216 = arith.addf %215, %214 : vector<8x128xf32>
    %217 = arith.divf %215, %216 : vector<8x128xf32>
    %c0_60 = arith.constant 0 : index
    %c0_61 = arith.constant 0 : index
    %218 = vector.load %arg9[%c0_60, %c0_61] : memref<8x128xf32, #tpu.memory_space<vmem>>, vector<8x128xf32>
    tpu.vector_store %arg9[%c0_60, %c0_61], %217 {strides = array<i32>} : memref<8x128xf32, #tpu.memory_space<vmem>>, vector<8x128xf32>,
    return
  }
  func.func @transform_0(%arg0: i32) -> (i32, i32, i32) {
    %c0_i32 = arith.constant 0 : i32
    %c0_i32_0 = arith.constant 0 : i32
    %c0_i32_1 = arith.constant 0 : i32
    return %c0_i32, %arg0, %c0_i32_0 : i32, i32, i32
  }
  func.func @transform_1(%arg0: i32) -> (i32, i32) {
    %c0_i32 = arith.constant 0 : i32
    %c0_i32_0 = arith.constant 0 : i32
    %c0_i32_1 = arith.constant 0 : i32
    return %c0_i32, %c0_i32_0 : i32, i32
  }
  func.func @transform_2(%arg0: i32) -> (i32, i32) {
    %c0_i32 = arith.constant 0 : i32
    %c0_i32_0 = arith.constant 0 : i32
    %c0_i32_1 = arith.constant 0 : i32
    return %c0_i32, %c0_i32_0 : i32, i32
  }
  func.func @transform_3(%arg0: i32) -> (i32, i32) {
    %c0_i32 = arith.constant 0 : i32
    %c0_i32_0 = arith.constant 0 : i32
    %c0_i32_1 = arith.constant 0 : i32
    return %c0_i32, %c0_i32_0 : i32, i32
  }
  func.func @transform_4(%arg0: i32) -> (i32, i32) {
    %c0_i32 = arith.constant 0 : i32
    %c0_i32_0 = arith.constant 0 : i32
    %c0_i32_1 = arith.constant 0 : i32
    return %c0_i32, %c0_i32_0 : i32, i32
  }
  func.func @transform_5(%arg0: i32) -> (i32, i32) {
    %c0_i32 = arith.constant 0 : i32
    %c0_i32_0 = arith.constant 0 : i32
    %c0_i32_1 = arith.constant 0 : i32
    return %c0_i32, %c0_i32_0 : i32, i32
  }
  func.func @transform_6(%arg0: i32) -> (i32, i32) {
    %c0_i32 = arith.constant 0 : i32
    %c0_i32_0 = arith.constant 0 : i32
    %c0_i32_1 = arith.constant 0 : i32
    return %c0_i32, %c0_i32_0 : i32, i32
  }
  func.func @transform_7(%arg0: i32) -> (i32, i32) {
    %c0_i32 = arith.constant 0 : i32
    %c0_i32_0 = arith.constant 0 : i32
    %c0_i32_1 = arith.constant 0 : i32
    return %c0_i32, %c0_i32_0 : i32, i32
  }
  func.func @transform_8(%arg0: i32) -> (i32, i32) {
    %c0_i32 = arith.constant 0 : i32
    %c0_i32_0 = arith.constant 0 : i32
    return %arg0, %c0_i32 : i32, i32
  }
}

</mosaic_0001>

<bundles_post_ra>
// kernel: tpu_custom_call.1
= control target key start
LH: loop header
LB: loop body
LE: loop exit
PB: predicated region body
PF: predicated region fallthrough
CT: control target
= control target key end

     0   :  { %13 = vsyncpa [#allocation3], 0  ;;  %s1384_s0 = inlined_call_operand.vmem [shape: s32[8,8,1], index: 0, kind: input, shape index: {}]   ;;  %s1385_s1 = inlined_call_operand.hbm [shape: f32[128,128], index: 1, kind: input, shape index: {}]   ;;  %s1386_s2 = inlined_call_operand.hbm [shape: f32[128,128], index: 2, kind: input, shape index: {}]   ;;  %s1387_s3 = inlined_call_operand.hbm [shape: f32[32,128], index: 3, kind: input, shape index: {}]   ;;  %s1388_s4 = inlined_call_operand.vmem [shape: f32[64,128], index: 4, kind: input, shape index: {}]   ;;  %s1389_s5 = inlined_call_operand.vmem [shape: f32[1,128], index: 5, kind: input, shape index: {}]   ;;  %s1390_s6 = inlined_call_operand.hbm [shape: f32[128,128], index: 6, kind: input, shape index: {}]   ;;  %s1391_s7 = inlined_call_operand.vmem [shape: f32[1,128], index: 7, kind: input, shape index: {}]   ;;  %s1392_s8 = inlined_call_operand.hbm [shape: f32[8,128], index: 8, kind: output, shape index: {}]  }
   0x1   :  { %14 = vsyncpa [#allocation6], 0 }
   0x2   :  { %15 = vsyncpa [#allocation9], 0 }
   0x3   :  { %16 = vsyncpa [#allocation4], 0  ;;  %s36_s29 = sshll.u32 %s1386_s2, 4  ;;  %s1148_s30 = smov [#allocation5]   ;;  %s37_s29 = int_to_ptr.hbm [resolvable:$true] %s36_s29 }
   0x4   :  { %s38_s9 = sshll.u32 %s1148_s30, 4  ;;  %s23_s12 = sshll.u32 %s1385_s1, 4  ;;  %s39_s9 = int_to_ptr.vmem [resolvable:$true] %s38_s9  ;;  %s24_s12 = int_to_ptr.hbm [resolvable:$true] %s23_s12 }
   0x5   :  { %s1149_s13 = smov 128   ;;  %s1150_s14 = smov 8  }
   0x6   :  { %44 = dma.hbm_to_vmem [thread:$0]  %s37_s29, 2048, %s39_s9, [#allocation6], %s1149_s13, %s1149_s13, %s1150_s14  }
   0x7   :  { %s1151_s15 = smov [#allocation2]   ;;  %s49_s19 = sshll.u32 %s1387_s3, 4  ;;  %s50_s19 = int_to_ptr.hbm [resolvable:$true] %s49_s19 }
   0x8   :  { %s25_s16 = sshll.u32 %s1151_s15, 4  ;;  %s66_s21 = sshll.u32 %s1390_s6, 4  ;;  %s26_s16 = int_to_ptr.vmem [resolvable:$true] %s25_s16  ;;  %s67_s21 = int_to_ptr.hbm [resolvable:$true] %s66_s21 }
   0x9   :  { %31 = dma.hbm_to_vmem [thread:$0]  %s24_s12, 2048, %s26_s16, [#allocation3], %s1149_s13, %s1149_s13, %s1150_s14  }
   0xa   :  { %s1152_s22 = smov [#allocation7]   ;;  %s1153_s1 = smov [#allocation8]  }
   0xb   :  { %s51_s23 = sshll.u32 %s1152_s22, 4  ;;  %s68_s24 = sshll.u32 %s1153_s1, 4  ;;  %s52_s23 = int_to_ptr.vmem [resolvable:$true] %s51_s23  ;;  %s69_s24 = int_to_ptr.vmem [resolvable:$true] %s68_s24 }
   0xc   :  { %57 = dma.hbm_to_vmem [thread:$0]  %s50_s19, 512, %s52_s23, [#allocation6], %s1149_s13, %s1149_s13, %s1150_s14  }
   0xd   :  { %74 = dma.hbm_to_vmem [thread:$0]  %s67_s21, 2048, %s69_s24, [#allocation9], %s1149_s13, %s1149_s13, %s1150_s14  }
   0xe   :  { %1140 = dma.done.wait [#allocation3], 2048  }
   0xf   :  { %1141 = vsyncadd [#allocation3], 4294965248 }
  0x10   :  { %1142 = dma.done.wait [#allocation6], 2560  }
  0x11   :  { %1143 = vsyncadd [#allocation6], 4294964736 }
  0x12   :  { %1144 = dma.done.wait [#allocation9], 2048  }
  0x13   :  { %1145 = vsyncadd [#allocation9], 4294965248  ;;  %v1154_v0 = vmov 0   ;;  %v93_v1 = vld [vmem:[%s1384_s0] sm:$0xff]  ;;  %v158_v2 = vld [vmem:[#allocation2 + $0x78] sm:$0xff]  ;;  %v1155_v22 = vmov 0.0   ;;  %v101_v23 = vlaneseq }
  0x14   :  { %957 = vset.pattern.permute.xlu0 %v1154_v0  ;;  %958 = vset.pattern.permute.xlu2 %v1154_v0  ;;  %v157_v3 = vld [vmem:[#allocation2 + $0x70] sm:$0xff]  ;;  %v156_v4 = vld [vmem:[#allocation2 + $0x68] sm:$0xff]  ;;  %v155_v5 = vld [vmem:[#allocation2 + $0x60] sm:$0xff]  ;;  %v1156_v26 = vmov 1.0   ;;  %s1157_s25 = smov 64   ;;  %s1158_s26 = smov 32  }
  0x15   :  { %959 = vset.pattern.permute.xlu1 %v1154_v0  ;;  %104 = vperm.xlu0 %957, %v93_v1   ;;  %v1221_v6 = vld [vmem:[#allocation7 + $0x18] sm:$0xff]  ;;  %v1224_v8 = vld [vmem:[#allocation7 + $0x10] sm:$0xff]  ;;  %v1226_v9 = vld [vmem:[#allocation7 + $0x8] sm:$0xff]  ;;  %v1257_v24 = vand.u32 127, %v101_v23  ;;  %vm204_vm5 = vcmask 261120  }
  0x16   :  { %159 = vmatpush.msra.mxu0 %v158_v2  ;;  %v154_v7 = vld [vmem:[#allocation2 + $0x58] sm:$0xff]  ;;  %220 = vmatpush.msra.mxu1 %v1221_v6  ;;  %v153_v10 = vld [vmem:[#allocation2 + $0x50] sm:$0xff]  ;;  %v152_v11 = vld [vmem:[#allocation2 + $0x48] sm:$0xff] }
  0x17   :  { %284 = vmatpush.msra.mxu2 %v1221_v6  ;;  %348 = vmatpush.msra.mxu3 %v1221_v6  ;;  %v151_v12 = vld [vmem:[#allocation2 + $0x40] sm:$0xff]  ;;  %v150_v13 = vld [vmem:[#allocation2 + $0x38] sm:$0xff]  ;;  %v149_v14 = vld [vmem:[#allocation2 + $0x30] sm:$0xff] }
  0x18   :  { %160 = vmatpush.msra.mxu0 %v157_v3  ;;  %221 = vmatpush.msra.mxu1 %v1224_v8  ;;  %v148_v15 = vld [vmem:[#allocation2 + $0x28] sm:$0xff]  ;;  %v147_v16 = vld [vmem:[#allocation2 + $0x20] sm:$0xff]  ;;  %v146_v17 = vld [vmem:[#allocation2 + $0x18] sm:$0xff] }
  0x19   :  { %285 = vmatpush.msra.mxu2 %v1224_v8  ;;  %349 = vmatpush.msra.mxu3 %v1224_v8  ;;  %v145_v18 = vld [vmem:[#allocation2 + $0x10] sm:$0xff]  ;;  %v144_v19 = vld [vmem:[#allocation2 + $0x8] sm:$0xff]  ;;  %v143_v20 = vld [vmem:[#allocation2] sm:$0xff] }
  0x1a   :  { %161 = vmatpush.msra.mxu0 %v156_v4  ;;  %222 = vmatpush.msra.mxu1 %v1226_v9  ;;  %v1236_v21 = vld [vmem:[#allocation7] sm:$0xff]  ;;  %v94_v53 = vld [vmem:[%s1384_s0 + $0x8] sm:$0xff] }
  0x1b   :  { %286 = vmatpush.msra.mxu2 %v1226_v9  ;;  %350 = vmatpush.msra.mxu3 %v1226_v9 }
  0x1c   :  { %162 = vmatpush.msra.mxu0 %v155_v5  ;;  %223 = vmatpush.msra.mxu1 %v1236_v21 }
  0x1d   :  { %224 = vmatmul.f32.vlgmr.msra.gmra.mxu1 %v1155_v22  ;;  %287 = vmatpush.msra.mxu2 %v1236_v21 }
  0x1e   :  { %163 = vmatpush.msra.mxu0 %v154_v7  ;;  %351 = vmatpush.msra.mxu3 %v1236_v21 }
  0x1f   :  { %412 = vmatpush.msrb.mxu1 %v1221_v6  ;;  %476 = vmatpush.msrb.mxu2 %v1221_v6 }
  0x20   :  { %164 = vmatpush.msra.mxu0 %v153_v10  ;;  %540 = vmatpush.msrb.mxu3 %v1221_v6 }
  0x21   :  { %413 = vmatpush.msrb.mxu1 %v1224_v8  ;;  %477 = vmatpush.msrb.mxu2 %v1224_v8 }
  0x22   :  { %165 = vmatpush.msra.mxu0 %v152_v11  ;;  %541 = vmatpush.msrb.mxu3 %v1224_v8 }
  0x23   :  { %414 = vmatpush.msrb.mxu1 %v1226_v9  ;;  %478 = vmatpush.msrb.mxu2 %v1226_v9 }
  0x24   :  { %166 = vmatpush.msra.mxu0 %v151_v12  ;;  %542 = vmatpush.msrb.mxu3 %v1226_v9 }
  0x25   :  { %415 = vmatpush.msrb.mxu1 %v1236_v21  ;;  %479 = vmatpush.msrb.mxu2 %v1236_v21 }
  0x26   :  { %167 = vmatpush.msra.mxu0 %v150_v13  ;;  %543 = vmatpush.msrb.mxu3 %v1236_v21 }
  0x27   :  { %604 = vmatpush.msra.mxu1 %v1221_v6 }
  0x28   :  { %168 = vmatpush.msra.mxu0 %v149_v14 }
  0x29   :  { %605 = vmatpush.msra.mxu1 %v1224_v8 }
  0x2a   :  { %169 = vmatpush.msra.mxu0 %v148_v15 }
  0x2b   :  { %606 = vmatpush.msra.mxu1 %v1226_v9 }
  0x2c   :  { %170 = vmatpush.msra.mxu0 %v147_v16  ;;  %v95_v16 = vld [vmem:[%s1384_s0 + $0x10] sm:$0xff] }
  0x2d   :  { %607 = vmatpush.msra.mxu1 %v1236_v21 }
  0x2e   :  { %171 = vmatpush.msra.mxu0 %v146_v17 }
  0x30   :  { %172 = vmatpush.msra.mxu0 %v145_v18 }
  0x32   :  { %173 = vmatpush.msra.mxu0 %v144_v19 }
  0x34   :  { %174 = vmatpush.msra.mxu0 %v143_v20 }
  0x87   :  { %v105_v25 = vpop.permute.xlu0 %104 }
  0x88   :  { %vm127_vm0 = vcmp.eq.s32.totalorder %v105_v25, %v1257_v24 }
  0x89   :  { %908 = vmatmul.msk.f32.vlgmr.msra.gmra.mxu0 %vm127_vm0, %v1156_v26 }
  0x9a   :  { %v225_v27 = vpop.f32.mrf.mxu1 }
 0x106   :  { %v176_v28 = vpop.f32.mrf.mxu0 }
 0x107   :  { %v228_v29 = vadd.f32 %v225_v27, %v176_v28 }
 0x109   :  { %v916_v30 = vmul.f32 -1.442695, %v228_v29 }
 0x10b   :  { %962 = vpow2.f32 %v916_v30 }
 0x111   :  { %v963_v31 = vpop.eup %962 }
 0x112   :  { %v232_v32 = vadd.f32 1.0, %v963_v31 }
 0x114   :  { %964 = vrcp.f32 %v232_v32  ;;  %v244_v36 = vand.u32 2147483648, %v232_v32  ;;  %v242_v38 = vand.u32 2147483647, %v232_v32  ;;  %vm238_vm2 = vweird.f32 %v232_v32 }
 0x116   :  { %v245_v40 = vor.u32 1.1754944e-38, %v244_v36  ;;  %vm243_vm4 = vcmp.eq.f32.partialorder %v242_v38, 8.507059e+37 }
 0x11a   :  { %v965_v33 = vpop.eup %964 }
 0x11b   :  { %v234_v34 = vmul.f32 %v965_v33, %v232_v32  ;;  %vm239_vm1 = vweird.f32 %v965_v33 }
 0x11c   :  { %vm240_vm3 = vmor %vm238_vm2, %vm239_vm1 }
 0x11d   :  { %v235_v35 = vsub.f32 1.0, %v234_v34 }
 0x11f   :  { %v236_v37 = vmul.f32 %v965_v33, %v235_v35 }
 0x121   :  { %v237_v39 = vadd.f32 %v965_v33, %v236_v37 }
 0x123   :  { %v241_v41 = vsel %vm240_vm3, %v965_v33, %v237_v39 }
 0x124   :  { %v246_v42 = vsel %vm243_vm4, %v245_v40, %v241_v41  ;;  %v96_v41 = vld [vmem:[%s1384_s0 + $0x18] sm:$0xff] }
 0x125   :  { %v248_v43 = vmul.f32 2.0, %v246_v42  ;;  %v250_v47 = vmul.f32 0.0, %v246_v42 }
 0x127   :  { %v917_v44 = vadd.f32 -1.0, %v248_v43 }
 0x129   :  { %252 = vrot.lane.b32.xlu0 %v917_v44, %s1157_s25 }
 0x19b   :  { %v253_v45 = vpop.permute.xlu0 %252 }
 0x19c   :  { %v255_v46 = vmul.f32 %v253_v45, %v246_v42 }
 0x19e   :  { %257 = vrot.lane.b32.xlu1 %v255_v46, %s1158_s26 }
 0x210   :  { %v258_v48 = vpop.permute.xlu1 %257 }
 0x211   :  { %v260_v49 = vadd.f32 %v258_v48, %v250_v47 }
 0x213   :  { %966 = vtanh.f32 %v260_v49 }
 0x219   :  { %v967_v50 = vpop.eup %966 }
 0x21a   :  { %263 = vrot.lane.b32.xlu1 %v967_v50, %s1157_s25 }
 0x28c   :  { %v264_v51 = vpop.permute.xlu1 %263 }
 0x28d   :  { %v266_v52 = vmul.f32 %v264_v51, %v246_v42 }
 0x28f   :  { %268 = vrot.lane.b32.xlu2 %v266_v52, %s1158_s26 }
 0x297   :  { %107 = vperm.xlu2 %958, %v94_v53  }
 0x2e9   :  { %v269_v54 = vpop.permute.xlu2 %268 }
 0x2ea   :  { %918 = vmatmul.msk.f32.vlgmr.msra.gmra.mxu2 %vm204_vm5, %v269_v54 }
 0x2eb   :  { %668 = vmatpush.msra.mxu2 %v1221_v6 }
 0x2ed   :  { %669 = vmatpush.msra.mxu2 %v1224_v8 }
 0x2ef   :  { %670 = vmatpush.msra.mxu2 %v1226_v9 }
 0x2f1   :  { %v108_v55 = vpop.permute.xlu2 %107  ;;  %671 = vmatpush.msra.mxu2 %v1236_v21 }
 0x2f2   :  { %vm128_vm6 = vcmp.eq.s32.totalorder %v108_v55, %v1257_v24 }
 0x2f3   :  { %909 = vmatmul.msk.f32.gmra.mxu0 %vm128_vm6, %v1156_v26 }
 0x36d   :  { %v289_v56 = vpop.f32.mrf.mxu2 }
 0x370   :  { %v179_v57 = vpop.f32.mrf.mxu0 }
 0x371   :  { %v292_v58 = vadd.f32 %v289_v56, %v179_v57 }
 0x373   :  { %v919_v59 = vmul.f32 -1.442695, %v292_v58 }
 0x375   :  { %968 = vpow2.f32 %v919_v59 }
 0x37b   :  { %v969_v60 = vpop.eup %968 }
 0x37c   :  { %v296_v61 = vadd.f32 1.0, %v969_v60 }
 0x37e   :  { %970 = vrcp.f32 %v296_v61  ;;  %v308_v1 = vand.u32 2147483648, %v296_v61  ;;  %v306_v3 = vand.u32 2147483647, %v296_v61  ;;  %vm302_vm8 = vweird.f32 %v296_v61 }
 0x380   :  { %v309_v5 = vor.u32 1.1754944e-38, %v308_v1  ;;  %vm307_vm10 = vcmp.eq.f32.partialorder %v306_v3, 8.507059e+37 }
 0x384   :  { %v971_v62 = vpop.eup %970 }
 0x385   :  { %v298_v63 = vmul.f32 %v971_v62, %v296_v61  ;;  %vm303_vm7 = vweird.f32 %v971_v62 }
 0x386   :  { %vm304_vm9 = vmor %vm302_vm8, %vm303_vm7 }
 0x387   :  { %v299_v0 = vsub.f32 1.0, %v298_v63 }
 0x389   :  { %v300_v2 = vmul.f32 %v971_v62, %v299_v0 }
 0x38b   :  { %v301_v4 = vadd.f32 %v971_v62, %v300_v2 }
 0x38d   :  { %v305_v6 = vsel %vm304_vm9, %v971_v62, %v301_v4 }
 0x38e   :  { %v310_v7 = vsel %vm307_vm10, %v309_v5, %v305_v6 }
 0x38f   :  { %v312_v8 = vmul.f32 2.0, %v310_v7  ;;  %v314_v12 = vmul.f32 %v310_v7, %v260_v49 }
 0x391   :  { %v920_v9 = vadd.f32 -1.0, %v312_v8  ;;  %v97_v8 = vld [vmem:[%s1384_s0 + $0x20] sm:$0xff] }
 0x393   :  { %316 = vrot.lane.b32.xlu0 %v920_v9, %s1157_s25 }
 0x405   :  { %v317_v10 = vpop.permute.xlu0 %316 }
 0x406   :  { %v319_v11 = vmul.f32 %v317_v10, %v310_v7 }
 0x408   :  { %321 = vrot.lane.b32.xlu1 %v319_v11, %s1158_s26 }
 0x410   :  { %110 = vperm.xlu1 %959, %v95_v16  }
 0x47a   :  { %v322_v13 = vpop.permute.xlu1 %321 }
 0x47b   :  { %v324_v14 = vadd.f32 %v322_v13, %v314_v12 }
 0x47d   :  { %972 = vtanh.f32 %v324_v14 }
 0x482   :  { %v111_v19 = vpop.permute.xlu1 %110 }
 0x483   :  { %v973_v15 = vpop.eup %972  ;;  %vm129_vm11 = vcmp.eq.s32.totalorder %v111_v19, %v1257_v24 }
 0x484   :  { %327 = vrot.lane.b32.xlu2 %v973_v15, %s1157_s25  ;;  %910 = vmatmul.msk.f32.gmra.mxu0 %vm129_vm11, %v1156_v26 }
 0x4de   :  { %v328_v17 = vpop.permute.xlu2 %327 }
 0x4df   :  { %v330_v18 = vmul.f32 %v328_v17, %v310_v7 }
 0x4e1   :  { %332 = vrot.lane.b32.xlu0 %v330_v18, %s1158_s26 }
 0x501   :  { %v182_v21 = vpop.f32.mrf.mxu0 }
 0x553   :  { %v333_v20 = vpop.permute.xlu0 %332 }
 0x554   :  { %921 = vmatmul.msk.f32.vlgmr.msra.gmra.mxu3 %vm204_vm5, %v333_v20 }
 0x5d7   :  { %v353_v22 = vpop.f32.mrf.mxu3 }
 0x5d8   :  { %v356_v23 = vadd.f32 %v353_v22, %v182_v21 }
 0x5da   :  { %v922_v25 = vmul.f32 -1.442695, %v356_v23 }
 0x5dc   :  { %974 = vpow2.f32 %v922_v25 }
 0x5e2   :  { %v975_v27 = vpop.eup %974 }
 0x5e3   :  { %v360_v28 = vadd.f32 1.0, %v975_v27 }
 0x5e5   :  { %976 = vrcp.f32 %v360_v28  ;;  %v372_v32 = vand.u32 2147483648, %v360_v28  ;;  %v370_v34 = vand.u32 2147483647, %v360_v28  ;;  %vm366_vm13 = vweird.f32 %v360_v28 }
 0x5e7   :  { %v373_v36 = vor.u32 1.1754944e-38, %v372_v32  ;;  %vm371_vm15 = vcmp.eq.f32.partialorder %v370_v34, 8.507059e+37 }
 0x5eb   :  { %v977_v29 = vpop.eup %976 }
 0x5ec   :  { %v362_v30 = vmul.f32 %v977_v29, %v360_v28  ;;  %vm367_vm12 = vweird.f32 %v977_v29 }
 0x5ed   :  { %vm368_vm14 = vmor %vm366_vm13, %vm367_vm12 }
 0x5ee   :  { %v363_v31 = vsub.f32 1.0, %v362_v30 }
 0x5f0   :  { %v364_v33 = vmul.f32 %v977_v29, %v363_v31 }
 0x5f2   :  { %v365_v35 = vadd.f32 %v977_v29, %v364_v33 }
 0x5f4   :  { %v369_v37 = vsel %vm368_vm14, %v977_v29, %v365_v35 }
 0x5f5   :  { %v374_v38 = vsel %vm371_vm15, %v373_v36, %v369_v37 }
 0x5f6   :  { %v376_v39 = vmul.f32 2.0, %v374_v38  ;;  %v378_v45 = vmul.f32 %v374_v38, %v324_v14 }
 0x5f8   :  { %v923_v40 = vadd.f32 -1.0, %v376_v39  ;;  %v98_v39 = vld [vmem:[%s1384_s0 + $0x28] sm:$0xff] }
 0x5fa   :  { %380 = vrot.lane.b32.xlu2 %v923_v40, %s1157_s25 }
 0x602   :  { %113 = vperm.xlu2 %958, %v96_v41  }
 0x654   :  { %v381_v42 = vpop.permute.xlu2 %380 }
 0x655   :  { %v383_v43 = vmul.f32 %v381_v42, %v374_v38 }
 0x657   :  { %385 = vrot.lane.b32.xlu0 %v383_v43, %s1158_s26 }
 0x65c   :  { %v114_v44 = vpop.permute.xlu2 %113 }
 0x65d   :  { %vm130_vm0 = vcmp.eq.s32.totalorder %v114_v44, %v1257_v24 }
 0x65e   :  { %911 = vmatmul.msk.f32.gmra.mxu0 %vm130_vm0, %v1156_v26 }
 0x6c9   :  { %v386_v46 = vpop.permute.xlu0 %385 }
 0x6ca   :  { %v388_v47 = vadd.f32 %v386_v46, %v378_v45 }
 0x6cc   :  { %978 = vtanh.f32 %v388_v47 }
 0x6d2   :  { %v979_v48 = vpop.eup %978 }
 0x6d3   :  { %391 = vrot.lane.b32.xlu1 %v979_v48, %s1157_s25 }
 0x6db   :  { %v185_v52 = vpop.f32.mrf.mxu0 }
 0x745   :  { %v392_v49 = vpop.permute.xlu1 %391 }
 0x746   :  { %v394_v50 = vmul.f32 %v392_v49, %v374_v38 }
 0x748   :  { %396 = vrot.lane.b32.xlu0 %v394_v50, %s1158_s26 }
 0x7ba   :  { %v397_v51 = vpop.permute.xlu0 %396 }
 0x7bb   :  { %924 = vmatmul.msk.f32.vlgmr.msrb.gmra.mxu1 %vm204_vm5, %v397_v51 }
 0x838   :  { %v417_v53 = vpop.f32.mrf.mxu1 }
 0x839   :  { %v420_v54 = vadd.f32 %v417_v53, %v185_v52 }
 0x83b   :  { %v925_v55 = vmul.f32 -1.442695, %v420_v54 }
 0x83d   :  { %980 = vpow2.f32 %v925_v55 }
 0x843   :  { %v981_v56 = vpop.eup %980 }
 0x844   :  { %v424_v57 = vadd.f32 1.0, %v981_v56 }
 0x846   :  { %982 = vrcp.f32 %v424_v57  ;;  %v436_v61 = vand.u32 2147483648, %v424_v57  ;;  %v434_v63 = vand.u32 2147483647, %v424_v57  ;;  %vm430_vm2 = vweird.f32 %v424_v57 }
 0x848   :  { %v437_v1 = vor.u32 1.1754944e-38, %v436_v61  ;;  %vm435_vm4 = vcmp.eq.f32.partialorder %v434_v63, 8.507059e+37 }
 0x84c   :  { %v983_v58 = vpop.eup %982 }
 0x84d   :  { %v426_v59 = vmul.f32 %v983_v58, %v424_v57  ;;  %vm431_vm1 = vweird.f32 %v983_v58 }
 0x84e   :  { %vm432_vm3 = vmor %vm430_vm2, %vm431_vm1 }
 0x84f   :  { %v427_v60 = vsub.f32 1.0, %v426_v59 }
 0x851   :  { %v428_v62 = vmul.f32 %v983_v58, %v427_v60 }
 0x853   :  { %v429_v0 = vadd.f32 %v983_v58, %v428_v62 }
 0x855   :  { %v433_v2 = vsel %vm432_vm3, %v983_v58, %v429_v0 }
 0x856   :  { %v438_v3 = vsel %vm435_vm4, %v437_v1, %v433_v2  ;;  %v99_v2 = vld [vmem:[%s1384_s0 + $0x30] sm:$0xff] }
 0x857   :  { %v440_v4 = vmul.f32 2.0, %v438_v3  ;;  %v442_v9 = vmul.f32 %v438_v3, %v388_v47 }
 0x859   :  { %v926_v5 = vadd.f32 -1.0, %v440_v4 }
 0x85b   :  { %444 = vrot.lane.b32.xlu1 %v926_v5, %s1157_s25 }
 0x8cd   :  { %v445_v6 = vpop.permute.xlu1 %444 }
 0x8ce   :  { %v447_v7 = vmul.f32 %v445_v6, %v438_v3 }
 0x8d0   :  { %449 = vrot.lane.b32.xlu2 %v447_v7, %s1158_s26 }
 0x8d8   :  { %116 = vperm.xlu2 %958, %v97_v8  }
 0x92a   :  { %v450_v10 = vpop.permute.xlu2 %449 }
 0x92b   :  { %v452_v11 = vadd.f32 %v450_v10, %v442_v9 }
 0x92d   :  { %984 = vtanh.f32 %v452_v11 }
 0x932   :  { %v117_v12 = vpop.permute.xlu2 %116 }
 0x933   :  { %v985_v13 = vpop.eup %984  ;;  %vm131_vm6 = vcmp.eq.s32.totalorder %v117_v12, %v1257_v24 }
 0x934   :  { %455 = vrot.lane.b32.xlu0 %v985_v13, %s1157_s25  ;;  %912 = vmatmul.msk.f32.gmra.mxu0 %vm131_vm6, %v1156_v26 }
 0x9a6   :  { %v456_v14 = vpop.permute.xlu0 %455 }
 0x9a7   :  { %v458_v15 = vmul.f32 %v456_v14, %v438_v3 }
 0x9a9   :  { %460 = vrot.lane.b32.xlu1 %v458_v15, %s1158_s26 }
 0x9b1   :  { %v188_v17 = vpop.f32.mrf.mxu0 }
 0xa1b   :  { %v461_v16 = vpop.permute.xlu1 %460 }
 0xa1c   :  { %927 = vmatmul.msk.f32.vlgmr.msrb.gmra.mxu2 %vm204_vm5, %v461_v16 }
 0xa9f   :  { %v481_v18 = vpop.f32.mrf.mxu2 }
 0xaa0   :  { %v484_v19 = vadd.f32 %v481_v18, %v188_v17 }
 0xaa2   :  { %v928_v20 = vmul.f32 -1.442695, %v484_v19 }
 0xaa4   :  { %986 = vpow2.f32 %v928_v20 }
 0xaaa   :  { %v987_v21 = vpop.eup %986 }
 0xaab   :  { %v488_v22 = vadd.f32 1.0, %v987_v21 }
 0xaad   :  { %988 = vrcp.f32 %v488_v22  ;;  %v500_v28 = vand.u32 2147483648, %v488_v22  ;;  %v498_v30 = vand.u32 2147483647, %v488_v22  ;;  %vm494_vm8 = vweird.f32 %v488_v22 }
 0xaaf   :  { %v501_v32 = vor.u32 1.1754944e-38, %v500_v28  ;;  %vm499_vm10 = vcmp.eq.f32.partialorder %v498_v30, 8.507059e+37 }
 0xab3   :  { %v989_v23 = vpop.eup %988 }
 0xab4   :  { %v490_v25 = vmul.f32 %v989_v23, %v488_v22  ;;  %vm495_vm7 = vweird.f32 %v989_v23 }
 0xab5   :  { %vm496_vm9 = vmor %vm494_vm8, %vm495_vm7 }
 0xab6   :  { %v491_v27 = vsub.f32 1.0, %v490_v25 }
 0xab8   :  { %v492_v29 = vmul.f32 %v989_v23, %v491_v27 }
 0xaba   :  { %v493_v31 = vadd.f32 %v989_v23, %v492_v29 }
 0xabc   :  { %v497_v33 = vsel %vm496_vm9, %v989_v23, %v493_v31 }
 0xabd   :  { %v502_v34 = vsel %vm499_vm10, %v501_v32, %v497_v33  ;;  %v730_v33 = vld [vmem:[#allocation5 + $0x78] sm:$0xff] }
 0xabe   :  { %v504_v35 = vmul.f32 2.0, %v502_v34  ;;  %v506_v40 = vmul.f32 %v502_v34, %v452_v11  ;;  %731 = vmatpush.msra.mxu3 %v730_v33 }
 0xac0   :  { %v929_v36 = vadd.f32 -1.0, %v504_v35  ;;  %v728_v35 = vld [vmem:[#allocation5 + $0x68] sm:$0xff] }
 0xac2   :  { %508 = vrot.lane.b32.xlu0 %v929_v36, %s1157_s25  ;;  %v727_v36 = vld [vmem:[#allocation5 + $0x60] sm:$0xff] }
 0xb34   :  { %v509_v37 = vpop.permute.xlu0 %508 }
 0xb35   :  { %v511_v38 = vmul.f32 %v509_v37, %v502_v34  ;;  %v726_v37 = vld [vmem:[#allocation5 + $0x58] sm:$0xff] }
 0xb37   :  { %513 = vrot.lane.b32.xlu1 %v511_v38, %s1158_s26  ;;  %v725_v38 = vld [vmem:[#allocation5 + $0x50] sm:$0xff] }
 0xb3f   :  { %119 = vperm.xlu1 %959, %v98_v39   ;;  %v724_v39 = vld [vmem:[#allocation5 + $0x48] sm:$0xff] }
 0xba9   :  { %v514_v41 = vpop.permute.xlu1 %513 }
 0xbaa   :  { %v516_v42 = vadd.f32 %v514_v41, %v506_v40  ;;  %v723_v40 = vld [vmem:[#allocation5 + $0x40] sm:$0xff]  ;;  %v722_v41 = vld [vmem:[#allocation5 + $0x38] sm:$0xff] }
 0xbac   :  { %990 = vtanh.f32 %v516_v42 }
 0xbb1   :  { %v120_v43 = vpop.permute.xlu1 %119 }
 0xbb2   :  { %v991_v44 = vpop.eup %990  ;;  %vm132_vm11 = vcmp.eq.s32.totalorder %v120_v43, %v1257_v24  ;;  %v720_v43 = vld [vmem:[#allocation5 + $0x28] sm:$0xff] }
 0xbb3   :  { %519 = vrot.lane.b32.xlu2 %v991_v44, %s1157_s25  ;;  %913 = vmatmul.msk.f32.gmra.mxu0 %vm132_vm11, %v1156_v26 }
 0xc0d   :  { %v520_v45 = vpop.permute.xlu2 %519 }
 0xc0e   :  { %v522_v46 = vmul.f32 %v520_v45, %v502_v34  ;;  %v729_v34 = vld [vmem:[#allocation5 + $0x70] sm:$0xff] }
 0xc0f   :  { %732 = vmatpush.msra.mxu3 %v729_v34 }
 0xc10   :  { %524 = vrot.lane.b32.xlu0 %v522_v46, %s1158_s26  ;;  %v100_v46 = vld [vmem:[%s1384_s0 + $0x38] sm:$0xff]  ;;  %s1159_s0 = smov 96  }
 0xc11   :  { %733 = vmatpush.msra.mxu3 %v728_v35 }
 0xc13   :  { %734 = vmatpush.msra.mxu3 %v727_v36 }
 0xc15   :  { %735 = vmatpush.msra.mxu3 %v726_v37 }
 0xc17   :  { %736 = vmatpush.msra.mxu3 %v725_v38 }
 0xc19   :  { %737 = vmatpush.msra.mxu3 %v724_v39 }
 0xc1b   :  { %738 = vmatpush.msra.mxu3 %v723_v40 }
 0xc1d   :  { %739 = vmatpush.msra.mxu3 %v722_v41  ;;  %v799_v41 = vld [vmem:[%s1388_s4 + $0x38] sm:$0xff] }
 0xc1e   :  { %816 = vmatpush.msrb.mxu1 %v799_v41 }
 0xc30   :  { %v191_v48 = vpop.f32.mrf.mxu0 }
 0xc82   :  { %v525_v47 = vpop.permute.xlu0 %524 }
 0xc83   :  { %930 = vmatmul.msk.f32.vlgmr.msrb.gmra.mxu3 %vm204_vm5, %v525_v47  ;;  %v719_v47 = vld [vmem:[#allocation5 + $0x20] sm:$0xff] }
 0xd06   :  { %v545_v49 = vpop.f32.mrf.mxu3 }
 0xd07   :  { %v548_v50 = vadd.f32 %v545_v49, %v191_v48  ;;  %v718_v48 = vld [vmem:[#allocation5 + $0x18] sm:$0xff]  ;;  %v717_v49 = vld [vmem:[#allocation5 + $0x10] sm:$0xff] }
 0xd09   :  { %v931_v51 = vmul.f32 -1.442695, %v548_v50  ;;  %v716_v50 = vld [vmem:[#allocation5 + $0x8] sm:$0xff] }
 0xd0b   :  { %992 = vpow2.f32 %v931_v51  ;;  %v715_v51 = vld [vmem:[#allocation5] sm:$0xff] }
 0xd11   :  { %v993_v52 = vpop.eup %992 }
 0xd12   :  { %v552_v53 = vadd.f32 1.0, %v993_v52 }
 0xd14   :  { %994 = vrcp.f32 %v552_v53  ;;  %v564_v57 = vand.u32 2147483648, %v552_v53  ;;  %v562_v59 = vand.u32 2147483647, %v552_v53  ;;  %vm558_vm13 = vweird.f32 %v552_v53 }
 0xd16   :  { %v565_v61 = vor.u32 1.1754944e-38, %v564_v57  ;;  %vm563_vm15 = vcmp.eq.f32.partialorder %v562_v59, 8.507059e+37 }
 0xd1a   :  { %v995_v54 = vpop.eup %994 }
 0xd1b   :  { %v554_v55 = vmul.f32 %v995_v54, %v552_v53  ;;  %vm559_vm12 = vweird.f32 %v995_v54 }
 0xd1c   :  { %vm560_vm14 = vmor %vm558_vm13, %vm559_vm12 }
 0xd1d   :  { %v555_v56 = vsub.f32 1.0, %v554_v55 }
 0xd1f   :  { %v556_v58 = vmul.f32 %v995_v54, %v555_v56 }
 0xd21   :  { %v557_v60 = vadd.f32 %v995_v54, %v556_v58 }
 0xd23   :  { %v561_v62 = vsel %vm560_vm14, %v995_v54, %v557_v60 }
 0xd24   :  { %v566_v63 = vsel %vm563_vm15, %v565_v61, %v561_v62  ;;  %vm804_vm15 = vcmask 523264  }
 0xd25   :  { %v568_v0 = vmul.f32 2.0, %v566_v63  ;;  %v570_v6 = vmul.f32 %v566_v63, %v516_v42  ;;  %v721_v42 = vld [vmem:[#allocation5 + $0x30] sm:$0xff] }
 0xd26   :  { %740 = vmatpush.msra.mxu3 %v721_v42  ;;  %v798_v42 = vld [vmem:[%s1388_s4 + $0x30] sm:$0xff] }
 0xd27   :  { %v932_v1 = vadd.f32 -1.0, %v568_v0  ;;  %817 = vmatpush.msrb.mxu1 %v798_v42 }
 0xd28   :  { %741 = vmatpush.msra.mxu3 %v720_v43  ;;  %v797_v43 = vld [vmem:[%s1388_s4 + $0x28] sm:$0xff] }
 0xd29   :  { %572 = vrot.lane.b32.xlu2 %v932_v1, %s1157_s25  ;;  %818 = vmatpush.msrb.mxu1 %v797_v43 }
 0xd2a   :  { %742 = vmatpush.msra.mxu3 %v719_v47  ;;  %v793_v47 = vld [vmem:[%s1388_s4 + $0x8] sm:$0xff] }
 0xd2c   :  { %743 = vmatpush.msra.mxu3 %v718_v48 }
 0xd2e   :  { %744 = vmatpush.msra.mxu3 %v717_v49 }
 0xd30   :  { %745 = vmatpush.msra.mxu3 %v716_v50  ;;  %v792_v50 = vld [vmem:[%s1388_s4] sm:$0xff] }
 0xd31   :  { %122 = vperm.xlu2 %958, %v99_v2  }
 0xd32   :  { %746 = vmatpush.msra.mxu3 %v715_v51  ;;  %v844_v51 = vld [vmem:[#allocation8 + $0x78] sm:$0xff] }
 0xd33   :  { %849 = vmatpush.msrb.mxu2 %v844_v51 }
 0xd83   :  { %v573_v3 = vpop.permute.xlu2 %572 }
 0xd84   :  { %v575_v4 = vmul.f32 %v573_v3, %v566_v63 }
 0xd86   :  { %577 = vrot.lane.b32.xlu0 %v575_v4, %s1158_s26 }
 0xd8b   :  { %v123_v5 = vpop.permute.xlu2 %122 }
 0xd8c   :  { %vm133_vm0 = vcmp.eq.s32.totalorder %v123_v5, %v1257_v24 }
 0xd8d   :  { %914 = vmatmul.msk.f32.gmra.mxu0 %vm133_vm0, %v1156_v26 }
 0xdf8   :  { %v578_v7 = vpop.permute.xlu0 %577 }
 0xdf9   :  { %v1322_v8 = vadd.f32 %v578_v7, %v570_v6 }
 0xdfb   :  { %996 = vtanh.f32 %v1322_v8 }
 0xe01   :  { %v997_v9 = vpop.eup %996 }
 0xe02   :  { %583 = vrot.lane.b32.xlu1 %v997_v9, %s1157_s25 }
 0xe0a   :  { %v194_v13 = vpop.f32.mrf.mxu0 }
 0xe74   :  { %v584_v10 = vpop.permute.xlu1 %583 }
 0xe75   :  { %v586_v11 = vmul.f32 %v584_v10, %v566_v63 }
 0xe77   :  { %588 = vrot.lane.b32.xlu0 %v586_v11, %s1158_s26 }
 0xee9   :  { %v589_v12 = vpop.permute.xlu0 %588 }
 0xeea   :  { %933 = vmatmul.msk.f32.vlgmr.msra.gmra.mxu1 %vm204_vm5, %v589_v12 }
 0xf67   :  { %v609_v14 = vpop.f32.mrf.mxu1 }
 0xf68   :  { %v612_v15 = vadd.f32 %v609_v14, %v194_v13 }
 0xf6a   :  { %v934_v16 = vmul.f32 -1.442695, %v612_v15 }
 0xf6c   :  { %998 = vpow2.f32 %v934_v16 }
 0xf72   :  { %v999_v17 = vpop.eup %998 }
 0xf73   :  { %v616_v18 = vadd.f32 1.0, %v999_v17 }
 0xf75   :  { %1000 = vrcp.f32 %v616_v18  ;;  %v628_v22 = vand.u32 2147483648, %v616_v18  ;;  %v626_v25 = vand.u32 2147483647, %v616_v18  ;;  %vm622_vm2 = vweird.f32 %v616_v18 }
 0xf77   :  { %v629_v28 = vor.u32 1.1754944e-38, %v628_v22  ;;  %vm627_vm4 = vcmp.eq.f32.partialorder %v626_v25, 8.507059e+37 }
 0xf7b   :  { %v1001_v19 = vpop.eup %1000 }
 0xf7c   :  { %v618_v20 = vmul.f32 %v1001_v19, %v616_v18  ;;  %vm623_vm1 = vweird.f32 %v1001_v19 }
 0xf7d   :  { %vm624_vm3 = vmor %vm622_vm2, %vm623_vm1 }
 0xf7e   :  { %v619_v21 = vsub.f32 1.0, %v618_v20 }
 0xf80   :  { %v620_v23 = vmul.f32 %v1001_v19, %v619_v21 }
 0xf82   :  { %v621_v27 = vadd.f32 %v1001_v19, %v620_v23 }
 0xf84   :  { %v625_v29 = vsel %vm624_vm3, %v1001_v19, %v621_v27 }
 0xf85   :  { %v630_v30 = vsel %vm627_vm4, %v629_v28, %v625_v29 }
 0xf86   :  { %v632_v31 = vmul.f32 2.0, %v630_v30  ;;  %v634_v52 = vmul.f32 %v630_v30, %v1322_v8 }
 0xf88   :  { %v935_v32 = vadd.f32 -1.0, %v632_v31 }
 0xf8a   :  { %636 = vrot.lane.b32.xlu1 %v935_v32, %s1157_s25 }
 0xffc   :  { %v637_v44 = vpop.permute.xlu1 %636 }
 0xffd   :  { %v639_v45 = vmul.f32 %v637_v44, %v630_v30  ;;  %v796_v44 = vld [vmem:[%s1388_s4 + $0x20] sm:$0xff] }
 0xffe   :  { %819 = vmatpush.msrb.mxu1 %v796_v44 }
 0xfff   :  { %641 = vrot.lane.b32.xlu2 %v639_v45, %s1158_s26  ;;  %v795_v45 = vld [vmem:[%s1388_s4 + $0x18] sm:$0xff] }
0x1000   :  { %820 = vmatpush.msrb.mxu1 %v795_v45 }
0x1007   :  { %125 = vperm.xlu2 %958, %v100_v46   ;;  %v794_v46 = vld [vmem:[%s1388_s4 + $0x10] sm:$0xff] }
0x1008   :  { %821 = vmatpush.msrb.mxu1 %v794_v46 }
0x100a   :  { %822 = vmatpush.msrb.mxu1 %v793_v47 }
0x100c   :  { %823 = vmatpush.msrb.mxu1 %v792_v50 }
0x1059   :  { %v642_v53 = vpop.permute.xlu2 %641 }
0x105a   :  { %v1334_v54 = vadd.f32 %v642_v53, %v634_v52  ;;  %v843_v52 = vld [vmem:[#allocation8 + $0x70] sm:$0xff]  ;;  %v842_v53 = vld [vmem:[#allocation8 + $0x68] sm:$0xff] }
0x105b   :  { %850 = vmatpush.msrb.mxu2 %v843_v52 }
0x105c   :  { %1002 = vtanh.f32 %v1334_v54 }
0x105d   :  { %851 = vmatpush.msrb.mxu2 %v842_v53 }
0x1061   :  { %v126_v55 = vpop.permute.xlu2 %125 }
0x1062   :  { %v1003_v56 = vpop.eup %1002  ;;  %vm134_vm6 = vcmp.eq.s32.totalorder %v126_v55, %v1257_v24  ;;  %v840_v55 = vld [vmem:[#allocation8 + $0x58] sm:$0xff] }
0x1063   :  { %647 = vrot.lane.b32.xlu0 %v1003_v56, %s1157_s25  ;;  %915 = vmatmul.msk.f32.gmra.mxu0 %vm134_vm6, %v1156_v26  ;;  %v839_v56 = vld [vmem:[#allocation8 + $0x50] sm:$0xff] }
0x1064   :  { %939 = vmatmul.msk.f32.vlgmr.msra.gmra.mxu3 %vm134_vm6, %v1156_v26 }
0x10d5   :  { %v648_v57 = vpop.permute.xlu0 %647 }
0x10d6   :  { %v650_v58 = vmul.f32 %v648_v57, %v630_v30  ;;  %v838_v57 = vld [vmem:[#allocation8 + $0x48] sm:$0xff] }
0x10d8   :  { %652 = vrot.lane.b32.xlu1 %v650_v58, %s1158_s26  ;;  %v837_v58 = vld [vmem:[#allocation8 + $0x40] sm:$0xff] }
0x10e0   :  { %v197_v10 = vpop.f32.mrf.mxu0 }
0x10e7   :  { %v748_v59 = vpop.f32.mrf.mxu3 }
0x10e8   :  { %v940_v60 = vmul.f32 -1.442695, %v748_v59  ;;  %v836_v59 = vld [vmem:[#allocation8 + $0x38] sm:$0xff] }
0x10ea   :  { %1004 = vpow2.f32 %v940_v60  ;;  %v835_v60 = vld [vmem:[#allocation8 + $0x30] sm:$0xff] }
0x10f0   :  { %v1005_v61 = vpop.eup %1004 }
0x10f1   :  { %v754_v62 = vadd.f32 1.0, %v1005_v61  ;;  %v834_v61 = vld [vmem:[#allocation8 + $0x28] sm:$0xff] }
0x10f3   :  { %1006 = vrcp.f32 %v754_v62  ;;  %v766_v24 = vand.u32 2147483648, %v754_v62  ;;  %v764_v3 = vand.u32 2147483647, %v754_v62  ;;  %vm760_vm8 = vweird.f32 %v754_v62 }
0x10f5   :  { %v767_v26 = vor.u32 1.1754944e-38, %v766_v24  ;;  %vm765_vm10 = vcmp.eq.f32.partialorder %v764_v3, 8.507059e+37  ;;  %v830_v3 = vld [vmem:[#allocation8 + $0x8] sm:$0xff] }
0x10f9   :  { %v1007_v63 = vpop.eup %1006 }
0x10fa   :  { %v756_v0 = vmul.f32 %v1007_v63, %v754_v62  ;;  %vm761_vm7 = vweird.f32 %v1007_v63  ;;  %v833_v62 = vld [vmem:[#allocation8 + $0x20] sm:$0xff] }
0x10fb   :  { %vm762_vm9 = vmor %vm760_vm8, %vm761_vm7 }
0x10fc   :  { %v757_v1 = vsub.f32 1.0, %v756_v0 }
0x10fe   :  { %v758_v2 = vmul.f32 %v1007_v63, %v757_v1 }
0x1100   :  { %v759_v4 = vadd.f32 %v1007_v63, %v758_v2  ;;  %v831_v2 = vld [vmem:[#allocation8 + $0x10] sm:$0xff] }
0x1102   :  { %v763_v5 = vsel %vm762_vm9, %v1007_v63, %v759_v4  ;;  %v832_v63 = vld [vmem:[#allocation8 + $0x18] sm:$0xff]  ;;  %v829_v4 = vld [vmem:[#allocation8] sm:$0xff] }
0x1103   :  { %v768_v6 = vsel %vm765_vm10, %v767_v26, %v763_v5  ;;  %v960_v26 = vld [vmem:[%s1389_s5] ss:$0 sm:$0xff]  ;;  %s1160_s5 = smov [#allocation10]  }
0x1104   :  { %v770_v7 = vmul.f32 2.0, %v768_v6  ;;  %s894_s12 = sshll.u32 %s1160_s5, 4  ;;  %s895_s12 = int_to_ptr.vmem [resolvable:$true] %s894_s12 }
0x1106   :  { %v941_v8 = vadd.f32 -1.0, %v770_v7 }
0x1108   :  { %773 = vrot.lane.b32.xlu2 %v941_v8, %s1157_s25  ;;  %v961_v8 = vld [vmem:[%s1391_s7] ss:$0 sm:$0xff]  ;;  %s896_s7 = sshll.u32 %s1392_s8, 4  ;;  %s897_s7 = int_to_ptr.hbm [resolvable:$true] %s896_s7 }
0x114a   :  { %v653_v9 = vpop.permute.xlu1 %652 }
0x114b   :  { %936 = vmatmul.msk.f32.vlgmr.msra.gmra.mxu2 %vm204_vm5, %v653_v9 }
0x1162   :  { %v774_v30 = vpop.permute.xlu2 %773 }
0x1163   :  { %v776_v31 = vmul.f32 %v774_v30, %v768_v6 }
0x11ce   :  { %v673_v11 = vpop.f32.mrf.mxu2 }
0x11cf   :  { %v676_v12 = vadd.f32 %v673_v11, %v197_v10 }
0x11d1   :  { %v937_v13 = vmul.f32 -1.442695, %v676_v12 }
0x11d3   :  { %1008 = vpow2.f32 %v937_v13 }
0x11d9   :  { %v1009_v14 = vpop.eup %1008 }
0x11da   :  { %v680_v15 = vadd.f32 1.0, %v1009_v14 }
0x11dc   :  { %1010 = vrcp.f32 %v680_v15  ;;  %v692_v19 = vand.u32 2147483648, %v680_v15  ;;  %v690_v21 = vand.u32 2147483647, %v680_v15  ;;  %vm686_vm12 = vweird.f32 %v680_v15 }
0x11dd   :  { %1012 = vtanh.f32 %v776_v31 }
0x11de   :  { %v693_v23 = vor.u32 1.1754944e-38, %v692_v19  ;;  %vm691_vm14 = vcmp.eq.f32.partialorder %v690_v21, 8.507059e+37 }
0x11e2   :  { %v1011_v16 = vpop.eup %1010 }
0x11e3   :  { %v682_v17 = vmul.f32 %v1011_v16, %v680_v15  ;;  %vm687_vm11 = vweird.f32 %v1011_v16  ;;  %v1013_v34 = vpop.eup %1012 }
0x11e4   :  { %vm688_vm13 = vmor %vm686_vm12, %vm687_vm11 }
0x11e5   :  { %v683_v18 = vsub.f32 1.0, %v682_v17 }
0x11e7   :  { %v684_v20 = vmul.f32 %v1011_v16, %v683_v18 }
0x11e9   :  { %v685_v22 = vadd.f32 %v1011_v16, %v684_v20 }
0x11eb   :  { %v689_v25 = vsel %vm688_vm13, %v1011_v16, %v685_v22 }
0x11ec   :  { %v694_v27 = vsel %vm691_vm14, %v693_v23, %v689_v25 }
0x11ed   :  { %v696_v28 = vmul.f32 2.0, %v694_v27  ;;  %v698_v35 = vmul.f32 %v694_v27, %v1334_v54  ;;  %v841_v54 = vld [vmem:[#allocation8 + $0x60] sm:$0xff] }
0x11ee   :  { %852 = vmatpush.msrb.mxu2 %v841_v54 }
0x11ef   :  { %v938_v29 = vadd.f32 -1.0, %v696_v28 }
0x11f0   :  { %853 = vmatpush.msrb.mxu2 %v840_v55 }
0x11f1   :  { %700 = vrot.lane.b32.xlu0 %v938_v29, %s1157_s25 }
0x11f2   :  { %854 = vmatpush.msrb.mxu2 %v839_v56 }
0x11f4   :  { %855 = vmatpush.msrb.mxu2 %v838_v57 }
0x11f6   :  { %856 = vmatpush.msrb.mxu2 %v837_v58 }
0x11f8   :  { %857 = vmatpush.msrb.mxu2 %v836_v59 }
0x11fa   :  { %858 = vmatpush.msrb.mxu2 %v835_v60 }
0x11fc   :  { %859 = vmatpush.msrb.mxu2 %v834_v61 }
0x11fe   :  { %860 = vmatpush.msrb.mxu2 %v833_v62 }
0x1200   :  { %861 = vmatpush.msrb.mxu2 %v832_v63 }
0x1202   :  { %862 = vmatpush.msrb.mxu2 %v831_v2 }
0x1204   :  { %863 = vmatpush.msrb.mxu2 %v830_v3 }
0x1206   :  { %864 = vmatpush.msrb.mxu2 %v829_v4 }
0x1263   :  { %v701_v32 = vpop.permute.xlu0 %700 }
0x1264   :  { %v703_v33 = vmul.f32 %v701_v32, %v694_v27 }
0x1266   :  { %705 = vrot.lane.b32.xlu1 %v703_v33, %s1158_s26 }
0x126e   :  { %779 = vrot.lane.b32.xlu1 %v1013_v34, %s1159_s0 }
0x12d8   :  { %v706_v36 = vpop.permute.xlu1 %705 }
0x12d9   :  { %v708_v37 = vadd.f32 %v706_v36, %v698_v35 }
0x12db   :  { %1014 = vtanh.f32 %v708_v37 }
0x12e0   :  { %v780_v39 = vpop.permute.xlu1 %779 }
0x12e1   :  { %v1015_v38 = vpop.eup %1014  ;;  %v782_v40 = vmul.f32 %v780_v39, %v768_v6 }
0x12e2   :  { %711 = vrot.lane.b32.xlu0 %v1015_v38, %s1157_s25 }
0x12ea   :  { %788 = vrot.lane.b32.xlu0 %v782_v40, %s1157_s25 }
0x1354   :  { %v712_v48 = vpop.permute.xlu0 %711 }
0x1355   :  { %v714_v49 = vmul.f32 %v712_v48, %v694_v27 }
0x1357   :  { %784 = vrot.lane.b32.xlu2 %v714_v49, %s1158_s26 }
0x135c   :  { %v789_v0 = vpop.permute.xlu0 %788 }
0x13b1   :  { %v785_v1 = vpop.permute.xlu2 %784 }
0x13b2   :  { %v791_v24 = vsel %vm204_vm5, %v785_v1, %v789_v0 }
0x13b3   :  { %942 = vmatmul.msk.f32.vlgmr.msrb.gmra.mxu1 %vm804_vm15, %v791_v24 }
0x1430   :  { %v825_v5 = vpop.f32.mrf.mxu1 }
0x1431   :  { %v826_v6 = vadd.f32 %v960_v26, %v825_v5 }
0x1433   :  { %v828_v7 = vmax.f32 %v826_v6, 0.0 }
0x1435   :  { %865 = vmatmul.f32.vlgmr.msrb.gmra.mxu2 %v828_v7 }
0x14b8   :  { %v866_v9 = vpop.f32.mrf.mxu2 }
0x14b9   :  { %v867_v10 = vadd.f32 %v961_v8, %v866_v9 }
0x14bb   :  { %v943_v11 = vmul.f32 -1.442695, %v867_v10 }
0x14bd   :  { %1016 = vpow2.f32 %v943_v11 }
0x14c3   :  { %v1017_v12 = vpop.eup %1016 }
0x14c4   :  { %v872_v13 = vadd.f32 1.0, %v1017_v12 }
0x14c6   :  { %1018 = vrcp.f32 %v872_v13  ;;  %v884_v17 = vand.u32 2147483648, %v872_v13  ;;  %v882_v19 = vand.u32 2147483647, %v872_v13  ;;  %vm878_vm0 = vweird.f32 %v872_v13 }
0x14c8   :  { %v885_v21 = vor.u32 1.1754944e-38, %v884_v17  ;;  %vm883_vm2 = vcmp.eq.f32.partialorder %v882_v19, 8.507059e+37 }
0x14cc   :  { %v1019_v14 = vpop.eup %1018 }
0x14cd   :  { %v874_v15 = vmul.f32 %v1019_v14, %v872_v13  ;;  %vm879_vm5 = vweird.f32 %v1019_v14 }
0x14ce   :  { %vm880_vm1 = vmor %vm878_vm0, %vm879_vm5 }
0x14cf   :  { %v875_v16 = vsub.f32 1.0, %v874_v15 }
0x14d1   :  { %v876_v18 = vmul.f32 %v1019_v14, %v875_v16 }
0x14d3   :  { %v877_v20 = vadd.f32 %v1019_v14, %v876_v18 }
0x14d5   :  { %v881_v22 = vsel %vm880_vm1, %v1019_v14, %v877_v20 }
0x14d6   :  { %v886_v23 = vsel %vm883_vm2, %v885_v21, %v881_v22 }
0x14d7   :  { %888 = vst [vmem:[#allocation10] sm:$0xff] %v886_v23 }
0x14d8   :  { %899 = dma.vmem_to_hbm [thread:$0]  %s895_s12, 128, %s897_s7, [#allocation4]  }
0x14d9   :  { %1146 = dma.done.wait [#allocation4], 128  }
0x14da   :  { %1147 = vsyncadd [#allocation4], 4294967168 }
0x14db   :  { %904 = vsyncpa [#allocation3], 1 }
0x14dc   :  { %905 = vsyncpa [#allocation6], 1 }
0x14dd   :  { %906 = vsyncpa [#allocation9], 1 }
0x14de   :  { %907 = vsyncpa [#allocation4], 1 }

</bundles_post_ra>
